<compile_context>
chip_gen: v7x
topology: tpu7x:2x2x1
jax: 0.10.0
libtpu: 0.0.40
codegen_flags: <defaults>
</compile_context>

<pallas_src>
import functools

import jax
import jax.numpy as jnp
from jax.experimental import pallas as pl
from jax.experimental.pallas import tpu as pltpu


WG_HIDDEN = 512   # weight_gate hidden width (fixed by the PyTorch module)
FG_HIDDEN = 256   # fusion_gate hidden width (fixed by the PyTorch module)


# ----------------------------------------------------------------------------
# Kernels
# ----------------------------------------------------------------------------
def _sigmoid(x, approx):
    # Clamp so exp(-x) can never overflow to inf (keeps the approximate
    # reciprocal well-defined); sigmoid is saturated far before |x| = 30.
    x = jnp.clip(x, -30.0, 30.0)
    e = jnp.exp(-x)
    if approx:
        return pl.reciprocal(1.0 + e, approx=True)
    return 1.0 / (1.0 + e)


def _linear_kernel(x_ref, w_ref, b_ref, o_ref):
    """y = x @ W + b.  Used for the lidar-only and (folded) image-only paths."""
    x = x_ref[...].astype(w_ref.dtype)
    y = jnp.dot(x, w_ref[...], preferred_element_type=jnp.float32) + b_ref[...]
    o_ref[...] = y.astype(o_ref.dtype)


def _fusion_kernel(
    lidar_ref, image_ref,
    wl_ref, bl_ref,        # lidar_adapter                       [L, O], [1, O]
    wpa_ref, bpa_ref,      # image_projection o image_adapter     [I, O], [1, O]
    wc1_ref, bc1_ref,      # fused gate L1 (weight_gate||fusion_gate)  [2O, 768], [1, 768]
    wg2d_ref, bg2d_ref,    # weight_gate L2 as lane-broadcast logit difference [512, O], [1, O]
    wf2_ref, bf2_ref,      # fusion_gate L2                       [256, O], [1, O]
    o_ref,
    *, approx_sigmoid,
):
    f32 = jnp.float32
    cdt = wl_ref.dtype  # compute dtype for MXU operands (f32 or bf16)

    lidar = lidar_ref[...].astype(cdt)
    image = image_ref[...].astype(cdt)

    # Adapted features (f32 accumulation on the MXU).  The image projection +
    # image adapter were folded into a single affine in prepare_params().
    adapted_lidar = (jnp.dot(lidar, wl_ref[...], preferred_element_type=f32)
                     + bl_ref[...])
    adapted_image = (jnp.dot(image, wpa_ref[...], preferred_element_type=f32)
                     + bpa_ref[...])

    # Single wide gate matmul: concat([al, ai]) @ (wg1 || wf1).  Both halves
    # are 128-lane aligned, so the concat + cast is cheap; K = 2*O fills the
    # 256-deep MXU on v6e/v7x.
    combined = jnp.concatenate([adapted_lidar, adapted_image], axis=1).astype(cdt)
    y = (jnp.dot(combined, wc1_ref[...], preferred_element_type=f32)
         + bc1_ref[...])
    y = jnp.maximum(y, 0.0)
    h = y[:, :WG_HIDDEN].astype(cdt)    # weight_gate hidden (512 lanes)
    g = y[:, WG_HIDDEN:].astype(cdt)    # fusion_gate hidden (256 lanes)

    # 2-class softmax == sigmoid(logit0 - logit1); the difference weights were
    # pre-broadcast across all O lanes -> no cross-lane reduce / slice needed.
    d = jnp.dot(h, wg2d_ref[...], preferred_element_type=f32) + bg2d_ref[...]
    lidar_w = _sigmoid(d, approx_sigmoid)
    weighted = adapted_image + lidar_w * (adapted_lidar - adapted_image)

    # fusion_gate second layer + sigmoid
    gate_logit = jnp.dot(g, wf2_ref[...], preferred_element_type=f32) + bf2_ref[...]
    gate = _sigmoid(gate_logit, approx_sigmoid)

    o_ref[...] = (weighted * gate).astype(o_ref.dtype)
    # TODO(synk): the PyTorch forward's host-side print() of mean adaptive
    # weights / gate values (pure logging) is not reproduced in the kernel.


# ----------------------------------------------------------------------------
# Parameter setup (mirrors the PyTorch module layout; weights stored [in, out])
# ----------------------------------------------------------------------------
def init_params(key, lidar_dim=128, image_dim=256, output_dim=128):
    ks = jax.random.split(key, 14)

    def lin(kw, kb, din, dout):
        w = jax.random.normal(kw, (din, dout), jnp.float32) * (1.0 / jnp.sqrt(din))
        b = jax.random.normal(kb, (1, dout), jnp.float32) * 0.01
        return w, b

    p = {}
    p["wl"], p["bl"] = lin(ks[0], ks[1], lidar_dim, output_dim)                # lidar_adapter
    p["wp"], p["bp"] = lin(ks[2], ks[3], image_dim, output_dim)                # image_projection
    p["wa"], p["ba"] = lin(ks[4], ks[5], output_dim, output_dim)               # image_adapter
    p["wg1"], p["bg1"] = lin(ks[6], ks[7], lidar_dim + output_dim, WG_HIDDEN)  # weight_gate[0]
    p["wg2"], p["bg2"] = lin(ks[8], ks[9], WG_HIDDEN, 2)                       # weight_gate[2]
    p["wf1"], p["bf1"] = lin(ks[10], ks[11], lidar_dim + output_dim, FG_HIDDEN)  # fusion_gate[0]
    p["wf2"], p["bf2"] = lin(ks[12], ks[13], FG_HIDDEN, output_dim)            # fusion_gate[2]
    p["dims"] = (lidar_dim, image_dim, output_dim)
    return p


def prepare_params(params, compute_dtype=jnp.bfloat16, approx_sigmoid=None):
    """One-time weight massaging for the kernels (hoisted out of forward).

    compute_dtype=jnp.bfloat16 uses the bf16 MXU path (recommended on v5e,
    v6e and v7x; accumulation stays f32).  jnp.float32 matches PyTorch
    numerics.  approx_sigmoid defaults to True for bf16 and False for f32;
    the approximate EUP reciprocal introduces ~2^-12 relative error.
    """
    L, I, O = params["dims"]
    # The PyTorch module's fusion path implicitly requires lidar_dim == output_dim
    # (concat([adapted_lidar, adapted_image]) is 2*O wide, Linear expects L+O).
    assert L == O, "AdaptiveFusion fusion path requires lidar_dim == output_dim"

    if approx_sigmoid is None:
        approx_sigmoid = compute_dtype != jnp.float32

    cast = lambda w: w.astype(compute_dtype)
    prep = {"dims": params["dims"], "approx_sigmoid": bool(approx_sigmoid)}

    prep["wl"], prep["bl"] = cast(params["wl"]), params["bl"]

    # Fold image_projection o image_adapter into one affine (exact algebra;
    # computed in f32 before any cast).
    wpa = params["wp"] @ params["wa"]
    bpa = params["bp"] @ params["wa"] + params["ba"]
    prep["wpa"], prep["bpa"] = cast(wpa), bpa

    # Fused gate first layers: weight_gate[0] || fusion_gate[0] concatenated
    # over the output axis -> one [2*O, 768] weight for a single K=2*O matmul.
    prep["wc1"] = cast(jnp.concatenate([params["wg1"], params["wf1"]], axis=1))
    prep["bc1"] = jnp.concatenate([params["bg1"], params["bf1"]], axis=1)

    # weight_gate second layer: 2-class softmax -> sigmoid of the logit
    # difference, pre-broadcast across all O lanes (no in-kernel lane work).
    wg2, bg2 = params["wg2"], params["bg2"]
    prep["wg2_d"] = cast(jnp.broadcast_to(wg2[:, 0:1] - wg2[:, 1:2],
                                          (wg2.shape[0], O)))
    prep["bg2_d"] = jnp.broadcast_to(bg2[:, 0:1] - bg2[:, 1:2], (1, O)) + 0.0

    prep["wf2"], prep["bf2"] = cast(params["wf2"]), params["bf2"]
    return prep


# ----------------------------------------------------------------------------
# pallas_call wrappers
# ----------------------------------------------------------------------------
def _round_up(x, m):
    return (x + m - 1) // m * m


def _batch_tiles(B):
    """Pick (tile, padded_batch).

    * tile capped at 512 rows (total VMEM at 512 is only a few MiB, far under
      every generation's scoped limit).
    * for B > 8 the grid always has >= 2 steps so the "parallel" batch axis
      can shard across v7x's two TensorCores.
    """
    Bp8 = _round_up(B, 8)
    if B <= 8:
        tile = Bp8
    else:
        tile = min(512, _round_up(pl.cdiv(Bp8, 2), 8))
    Bp = _round_up(Bp8, tile)
    return tile, Bp


def _pad_rows(x, Bp):
    B = x.shape[0]
    return x if B == Bp else jnp.pad(x, ((0, Bp - B), (0, 0)))


def _act_spec(tile, dim):
    return pl.BlockSpec((tile, dim), lambda i: (i, 0))


def _weight_spec(arr):
    # Full-array block; constant index_map keeps the tile VMEM-resident across
    # the batch grid (Pallas skips re-DMA when the block index repeats).
    shape = arr.shape
    return pl.BlockSpec(shape, lambda i: (0,) * len(shape))


_COMPILER_PARAMS = pltpu.CompilerParams(dimension_semantics=("parallel",))


def _run_linear(x, w, b, out_dim):
    B, in_dim = x.shape
    tile, Bp = _batch_tiles(B)
    out = pl.pallas_call(
        _linear_kernel,
        out_shape=jax.ShapeDtypeStruct((Bp, out_dim), jnp.float32),
        grid=(Bp // tile,),
        in_specs=[_act_spec(tile, in_dim), _weight_spec(w), _weight_spec(b)],
        out_specs=_act_spec(tile, out_dim),
        compiler_params=_COMPILER_PARAMS,
    )(_pad_rows(x, Bp), w, b)
    return out[:B]


def adaptive_fusion_forward(prep, lidar_features=None, image_features=None):
    """Mirrors AdaptiveFusion.forward (three branches). `prep` = prepare_params(...)."""
    L, I, O = prep["dims"]
    has_lidar = lidar_features is not None
    has_image = image_features is not None

    # TODO(synk): if the surrounding model can provide bf16 activations (and
    # consume bf16 output), pass them through directly to halve activation HBM
    # traffic; do not add a standalone cast op in the wrapper.

    if has_lidar and not has_image:
        return _run_linear(lidar_features, prep["wl"], prep["bl"], O)

    if has_image and not has_lidar:
        # image_adapter(image_projection(x)) == x @ wpa + bpa (folded affine).
        return _run_linear(image_features, prep["wpa"], prep["bpa"], O)

    if has_lidar and has_image:
        B = lidar_features.shape[0]
        tile, Bp = _batch_tiles(B)
        kernel = functools.partial(_fusion_kernel,
                                   approx_sigmoid=prep["approx_sigmoid"])
        weights = (prep["wl"], prep["bl"], prep["wpa"], prep["bpa"],
                   prep["wc1"], prep["bc1"],
                   prep["wg2_d"], prep["bg2_d"], prep["wf2"], prep["bf2"])
        out = pl.pallas_call(
            kernel,
            out_shape=jax.ShapeDtypeStruct((Bp, O), jnp.float32),
            grid=(Bp // tile,),
            in_specs=[_act_spec(tile, L), _act_spec(tile, I)]
                     + [_weight_spec(w) for w in weights],
            out_specs=_act_spec(tile, O),
            compiler_params=_COMPILER_PARAMS,
        )(_pad_rows(lidar_features, Bp), _pad_rows(image_features, Bp), *weights)
        return out[:B]

    raise ValueError("At least one modality (LiDAR or image) must be provided")


# ----------------------------------------------------------------------------
# Pure-JAX reference (mirrors the PyTorch math exactly, f32)
# ----------------------------------------------------------------------------
def reference_forward(params, lidar_features=None, image_features=None):
    def lin(x, w, b):
        return x @ w + b

    has_lidar = lidar_features is not None
    has_image = image_features is not None

    if has_lidar and not has_image:
        return lin(lidar_features, params["wl"], params["bl"])
    if has_image and not has_lidar:
        return lin(lin(image_features, params["wp"], params["bp"]),
                   params["wa"], params["ba"])

    adapted_lidar = lin(lidar_features, params["wl"], params["bl"])
    adapted_image = lin(lin(image_features, params["wp"], params["bp"]),
                        params["wa"], params["ba"])
    combined = jnp.concatenate([adapted_lidar, adapted_image], axis=1)
    h = jnp.maximum(lin(combined, params["wg1"], params["bg1"]), 0.0)
    weights = jax.nn.softmax(lin(h, params["wg2"], params["bg2"]), axis=1)
    weighted = weights[:, 0:1] * adapted_lidar + weights[:, 1:2] * adapted_image
    g = jnp.maximum(lin(combined, params["wf1"], params["bf1"]), 0.0)
    gate = jax.nn.sigmoid(lin(g, params["wf2"], params["bf2"]))
    return weighted * gate


# ----------------------------------------------------------------------------
if __name__ == "__main__":
    key = jax.random.PRNGKey(0)
    k_params, k_lidar, k_image = jax.random.split(key, 3)

    # Small shapes consistent with AdaptiveFusion(lidar_dim, image_dim, output_dim)
    # (the module requires lidar_dim == output_dim for the fusion path).
    B, LIDAR_DIM, IMAGE_DIM, OUT_DIM = 8, 128, 256, 128
    params = init_params(k_params, LIDAR_DIM, IMAGE_DIM, OUT_DIM)

    lidar = jax.random.normal(k_lidar, (B, LIDAR_DIM), jnp.float32)
    image = jax.random.normal(k_image, (B, IMAGE_DIM), jnp.float32)

    ref_fusion = reference_forward(params, lidar, image)
    ref_lidar = reference_forward(params, lidar, None)
    ref_image = reference_forward(params, None, image)

    # f32 compute path, exact sigmoid: matches PyTorch numerics (the folded
    # image affine only reassociates f32 rounding).
    prep_f32 = prepare_params(params, compute_dtype=jnp.float32)
    out_fusion = jax.block_until_ready(adaptive_fusion_forward(prep_f32, lidar, image))
    out_lidar = jax.block_until_ready(adaptive_fusion_forward(prep_f32, lidar, None))
    out_image = jax.block_until_ready(adaptive_fusion_forward(prep_f32, None, image))

    assert out_fusion.shape == (B, OUT_DIM)
    assert jnp.allclose(out_fusion, ref_fusion, rtol=1e-3, atol=1e-3), "fusion mismatch"
    assert jnp.allclose(out_lidar, ref_lidar, rtol=1e-4, atol=1e-4), "lidar-only mismatch"
    assert jnp.allclose(out_image, ref_image, rtol=2e-4, atol=2e-4), "image-only mismatch"

    # bf16 weight path (native MXU dtype on v5e/v6e/v7x; f32 accumulation,
    # approximate EUP sigmoid reciprocal).
    prep_bf16 = prepare_params(params, compute_dtype=jnp.bfloat16)
    out_bf16 = jax.block_until_ready(adaptive_fusion_forward(prep_bf16, lidar, image))
    assert out_bf16.shape == (B, OUT_DIM)
    assert jnp.allclose(out_bf16, ref_fusion, rtol=1e-1, atol=1e-1), "bf16 fusion mismatch"

    # Odd batch exercising the padded, >=2-step grid path.
    B2 = 13
    lidar2 = jax.random.normal(jax.random.PRNGKey(7), (B2, LIDAR_DIM), jnp.float32)
    image2 = jax.random.normal(jax.random.PRNGKey(8), (B2, IMAGE_DIM), jnp.float32)
    out2 = jax.block_until_ready(adaptive_fusion_forward(prep_f32, lidar2, image2))
    ref2 = reference_forward(params, lidar2, image2)
    assert out2.shape == (B2, OUT_DIM)
    assert jnp.allclose(out2, ref2, rtol=1e-3, atol=1e-3), "multi-tile fusion mismatch"

    print("KERNEL_OK")
</pallas_src>

<mosaic_0001>
module attributes {stable_mosaic.version = 11 : i64} {
  func.func @_fusion_kernel(%arg0: i32, %arg1: memref<8x128xf32, #tpu.memory_space<vmem>>, %arg2: memref<8x256xf32, #tpu.memory_space<vmem>>, %arg3: memref<128x128xf32, #tpu.memory_space<vmem>>, %arg4: memref<1x128xf32, #tpu.memory_space<vmem>>, %arg5: memref<256x128xf32, #tpu.memory_space<vmem>>, %arg6: memref<1x128xf32, #tpu.memory_space<vmem>>, %arg7: memref<256x768xf32, #tpu.memory_space<vmem>>, %arg8: memref<1x768xf32, #tpu.memory_space<vmem>>, %arg9: memref<512x128xf32, #tpu.memory_space<vmem>>, %arg10: memref<1x128xf32, #tpu.memory_space<vmem>>, %arg11: memref<256x128xf32, #tpu.memory_space<vmem>>, %arg12: memref<1x128xf32, #tpu.memory_space<vmem>>, %arg13: memref<8x128xf32, #tpu.memory_space<vmem>>) attributes {dimension_semantics = [#tpu.dimension_semantics<parallel>], iteration_bounds = array<i64: 1>, scalar_prefetch = 0 : i64, scratch_operands = 0 : i64, tpu.core_type = #tpu.core_type<tc>, window_params = [{transform_indices = @transform_0, window_bounds = array<i64: 8, 128>}, {transform_indices = @transform_1, window_bounds = array<i64: 8, 256>}, {pipeline_mode = #tpu.pipeline_mode<synchronous>, transform_indices = @transform_2, window_bounds = array<i64: 128, 128>}, {pipeline_mode = #tpu.pipeline_mode<synchronous>, transform_indices = @transform_3, window_bounds = array<i64: 1, 128>}, {pipeline_mode = #tpu.pipeline_mode<synchronous>, transform_indices = @transform_4, window_bounds = array<i64: 256, 128>}, {pipeline_mode = #tpu.pipeline_mode<synchronous>, transform_indices = @transform_5, window_bounds = array<i64: 1, 128>}, {pipeline_mode = #tpu.pipeline_mode<synchronous>, transform_indices = @transform_6, window_bounds = array<i64: 256, 768>}, {pipeline_mode = #tpu.pipeline_mode<synchronous>, transform_indices = @transform_7, window_bounds = array<i64: 1, 768>}, {pipeline_mode = #tpu.pipeline_mode<synchronous>, transform_indices = @transform_8, window_bounds = array<i64: 512, 128>}, {pipeline_mode = #tpu.pipeline_mode<synchronous>, transform_indices = @transform_9, window_bounds = array<i64: 1, 128>}, {pipeline_mode = #tpu.pipeline_mode<synchronous>, transform_indices = @transform_10, window_bounds = array<i64: 256, 128>}, {pipeline_mode = #tpu.pipeline_mode<synchronous>, transform_indices = @transform_11, window_bounds = array<i64: 1, 128>}, {transform_indices = @transform_12, window_bounds = array<i64: 8, 128>}]} {
    %c0 = arith.constant 0 : index
    %c0_0 = arith.constant 0 : index
    %0 = vector.load %arg1[%c0, %c0_0] : memref<8x128xf32, #tpu.memory_space<vmem>>, vector<8x128xf32>
    %c0_1 = arith.constant 0 : index
    %c0_2 = arith.constant 0 : index
    %1 = vector.load %arg2[%c0_1, %c0_2] : memref<8x256xf32, #tpu.memory_space<vmem>>, vector<8x256xf32>
    %c0_3 = arith.constant 0 : index
    %c0_4 = arith.constant 0 : index
    %2 = vector.load %arg3[%c0_3, %c0_4] : memref<128x128xf32, #tpu.memory_space<vmem>>, vector<128x128xf32>
    %cst = arith.constant dense<0.000000e+00> : vector<8x128xf32>
    %3 = tpu.matmul %0, %2, %cst {dimension_numbers = #tpu.dot_dimension_numbers<[1], [0], [0], [1], [0, 0, 1, 1], [], []>} : vector<8x128xf32>, vector<128x128xf32>, vector<8x128xf32> -> vector<8x128xf32>
    %c0_5 = arith.constant 0 : index
    %c0_6 = arith.constant 0 : index
    %4 = vector.load %arg4[%c0_5, %c0_6] : memref<1x128xf32, #tpu.memory_space<vmem>>, vector<1x128xf32>
    %5 = vector.broadcast %4 : vector<1x128xf32> to vector<8x128xf32>
    %6 = arith.addf %3, %5 : vector<8x128xf32>
    %c0_7 = arith.constant 0 : index
    %c0_8 = arith.constant 0 : index
    %7 = vector.load %arg5[%c0_7, %c0_8] : memref<256x128xf32, #tpu.memory_space<vmem>>, vector<256x128xf32>
    %cst_9 = arith.constant dense<0.000000e+00> : vector<8x128xf32>
    %8 = tpu.matmul %1, %7, %cst_9 {dimension_numbers = #tpu.dot_dimension_numbers<[1], [0], [0], [1], [0, 0, 1, 1], [], []>} : vector<8x256xf32>, vector<256x128xf32>, vector<8x128xf32> -> vector<8x128xf32>
    %c0_10 = arith.constant 0 : index
    %c0_11 = arith.constant 0 : index
    %9 = vector.load %arg6[%c0_10, %c0_11] : memref<1x128xf32, #tpu.memory_space<vmem>>, vector<1x128xf32>
    %10 = vector.broadcast %9 : vector<1x128xf32> to vector<8x128xf32>
    %11 = arith.addf %8, %10 : vector<8x128xf32>
    %12 = tpu.concatenate %6, %11 in 1 : vector<8x128xf32>, vector<8x128xf32> -> vector<8x256xf32>
    %c0_12 = arith.constant 0 : index
    %c0_13 = arith.constant 0 : index
    %13 = vector.load %arg7[%c0_12, %c0_13] : memref<256x768xf32, #tpu.memory_space<vmem>>, vector<256x768xf32>
    %cst_14 = arith.constant dense<0.000000e+00> : vector<8x768xf32>
    %14 = tpu.matmul %12, %13, %cst_14 {dimension_numbers = #tpu.dot_dimension_numbers<[1], [0], [0], [1], [0, 0, 1, 1], [], []>} : vector<8x256xf32>, vector<256x768xf32>, vector<8x768xf32> -> vector<8x768xf32>
    %c0_15 = arith.constant 0 : index
    %c0_16 = arith.constant 0 : index
    %15 = vector.load %arg8[%c0_15, %c0_16] : memref<1x768xf32, #tpu.memory_space<vmem>>, vector<1x768xf32>
    %16 = vector.broadcast %15 : vector<1x768xf32> to vector<8x768xf32>
    %17 = arith.addf %14, %16 : vector<8x768xf32>
    %cst_17 = arith.constant 0.000000e+00 : f32
    %18 = vector.broadcast %cst_17 : f32 to vector<8x768xf32>
    %19 = arith.maximumf %17, %18 : vector<8x768xf32>
    %20 = vector.extract_strided_slice %19 {offsets = [0, 0], sizes = [8, 512], strides = [1, 1]} : vector<8x768xf32> to vector<8x512xf32>
    %21 = vector.extract_strided_slice %19 {offsets = [0, 512], sizes = [8, 256], strides = [1, 1]} : vector<8x768xf32> to vector<8x256xf32>
    %c0_18 = arith.constant 0 : index
    %c0_19 = arith.constant 0 : index
    %22 = vector.load %arg9[%c0_18, %c0_19] : memref<512x128xf32, #tpu.memory_space<vmem>>, vector<512x128xf32>
    %cst_20 = arith.constant dense<0.000000e+00> : vector<8x128xf32>
    %23 = tpu.matmul %20, %22, %cst_20 {dimension_numbers = #tpu.dot_dimension_numbers<[1], [0], [0], [1], [0, 0, 1, 1], [], []>} : vector<8x512xf32>, vector<512x128xf32>, vector<8x128xf32> -> vector<8x128xf32>
    %c0_21 = arith.constant 0 : index
    %c0_22 = arith.constant 0 : index
    %24 = vector.load %arg10[%c0_21, %c0_22] : memref<1x128xf32, #tpu.memory_space<vmem>>, vector<1x128xf32>
    %25 = vector.broadcast %24 : vector<1x128xf32> to vector<8x128xf32>
    %26 = arith.addf %23, %25 : vector<8x128xf32>
    %cst_23 = arith.constant -3.000000e+01 : f32
    %cst_24 = arith.constant 3.000000e+01 : f32
    %27 = vector.broadcast %cst_23 : f32 to vector<8x128xf32>
    %28 = arith.maximumf %27, %26 : vector<8x128xf32>
    %29 = vector.broadcast %cst_24 : f32 to vector<8x128xf32>
    %30 = arith.minimumf %29, %28 : vector<8x128xf32>
    %cst_25 = arith.constant 0.000000e+00 : f32
    %31 = vector.broadcast %cst_25 : f32 to vector<8x128xf32>
    %32 = arith.subf %31, %30 : vector<8x128xf32>
    %33 = math.exp %32 : vector<8x128xf32>
    %cst_26 = arith.constant 1.000000e+00 : f32
    %34 = vector.broadcast %cst_26 : f32 to vector<8x128xf32>
    %35 = arith.addf %34, %33 : vector<8x128xf32>
    %cst_27 = arith.constant 1.000000e+00 : f32
    %36 = vector.broadcast %cst_27 : f32 to vector<8x128xf32>
    %37 = arith.divf %36, %35 : vector<8x128xf32>
    %38 = arith.subf %6, %11 : vector<8x128xf32>
    %39 = arith.mulf %37, %38 : vector<8x128xf32>
    %40 = arith.addf %11, %39 : vector<8x128xf32>
    %c0_28 = arith.constant 0 : index
    %c0_29 = arith.constant 0 : index
    %41 = vector.load %arg11[%c0_28, %c0_29] : memref<256x128xf32, #tpu.memory_space<vmem>>, vector<256x128xf32>
    %cst_30 = arith.constant dense<0.000000e+00> : vector<8x128xf32>
    %42 = tpu.matmul %21, %41, %cst_30 {dimension_numbers = #tpu.dot_dimension_numbers<[1], [0], [0], [1], [0, 0, 1, 1], [], []>} : vector<8x256xf32>, vector<256x128xf32>, vector<8x128xf32> -> vector<8x128xf32>
    %c0_31 = arith.constant 0 : index
    %c0_32 = arith.constant 0 : index
    %43 = vector.load %arg12[%c0_31, %c0_32] : memref<1x128xf32, #tpu.memory_space<vmem>>, vector<1x128xf32>
    %44 = vector.broadcast %43 : vector<1x128xf32> to vector<8x128xf32>
    %45 = arith.addf %42, %44 : vector<8x128xf32>
    %cst_33 = arith.constant -3.000000e+01 : f32
    %cst_34 = arith.constant 3.000000e+01 : f32
    %46 = vector.broadcast %cst_33 : f32 to vector<8x128xf32>
    %47 = arith.maximumf %46, %45 : vector<8x128xf32>
    %48 = vector.broadcast %cst_34 : f32 to vector<8x128xf32>
    %49 = arith.minimumf %48, %47 : vector<8x128xf32>
    %cst_35 = arith.constant 0.000000e+00 : f32
    %50 = vector.broadcast %cst_35 : f32 to vector<8x128xf32>
    %51 = arith.subf %50, %49 : vector<8x128xf32>
    %52 = math.exp %51 : vector<8x128xf32>
    %cst_36 = arith.constant 1.000000e+00 : f32
    %53 = vector.broadcast %cst_36 : f32 to vector<8x128xf32>
    %54 = arith.addf %53, %52 : vector<8x128xf32>
    %cst_37 = arith.constant 1.000000e+00 : f32
    %55 = vector.broadcast %cst_37 : f32 to vector<8x128xf32>
    %56 = arith.divf %55, %54 : vector<8x128xf32>
    %57 = arith.mulf %40, %56 : vector<8x128xf32>
    %c0_38 = arith.constant 0 : index
    %c0_39 = arith.constant 0 : index
    %58 = vector.load %arg13[%c0_38, %c0_39] : memref<8x128xf32, #tpu.memory_space<vmem>>, vector<8x128xf32>
    tpu.vector_store %arg13[%c0_38, %c0_39], %57 {strides = array<i32>} : memref<8x128xf32, #tpu.memory_space<vmem>>, vector<8x128xf32>,
    return
  }
  func.func @transform_0(%arg0: i32) -> (i32, i32) {
    %c0_i32 = arith.constant 0 : i32
    %c0_i32_0 = arith.constant 0 : i32
    return %arg0, %c0_i32 : i32, i32
  }
  func.func @transform_1(%arg0: i32) -> (i32, i32) {
    %c0_i32 = arith.constant 0 : i32
    %c0_i32_0 = arith.constant 0 : i32
    return %arg0, %c0_i32 : i32, i32
  }
  func.func @transform_2(%arg0: i32) -> (i32, i32) {
    %c0_i32 = arith.constant 0 : i32
    %c0_i32_0 = arith.constant 0 : i32
    %c0_i32_1 = arith.constant 0 : i32
    return %c0_i32, %c0_i32_0 : i32, i32
  }
  func.func @transform_3(%arg0: i32) -> (i32, i32) {
    %c0_i32 = arith.constant 0 : i32
    %c0_i32_0 = arith.constant 0 : i32
    %c0_i32_1 = arith.constant 0 : i32
    return %c0_i32, %c0_i32_0 : i32, i32
  }
  func.func @transform_4(%arg0: i32) -> (i32, i32) {
    %c0_i32 = arith.constant 0 : i32
    %c0_i32_0 = arith.constant 0 : i32
    %c0_i32_1 = arith.constant 0 : i32
    return %c0_i32, %c0_i32_0 : i32, i32
  }
  func.func @transform_5(%arg0: i32) -> (i32, i32) {
    %c0_i32 = arith.constant 0 : i32
    %c0_i32_0 = arith.constant 0 : i32
    %c0_i32_1 = arith.constant 0 : i32
    return %c0_i32, %c0_i32_0 : i32, i32
  }
  func.func @transform_6(%arg0: i32) -> (i32, i32) {
    %c0_i32 = arith.constant 0 : i32
    %c0_i32_0 = arith.constant 0 : i32
    %c0_i32_1 = arith.constant 0 : i32
    return %c0_i32, %c0_i32_0 : i32, i32
  }
  func.func @transform_7(%arg0: i32) -> (i32, i32) {
    %c0_i32 = arith.constant 0 : i32
    %c0_i32_0 = arith.constant 0 : i32
    %c0_i32_1 = arith.constant 0 : i32
    return %c0_i32, %c0_i32_0 : i32, i32
  }
  func.func @transform_8(%arg0: i32) -> (i32, i32) {
    %c0_i32 = arith.constant 0 : i32
    %c0_i32_0 = arith.constant 0 : i32
    %c0_i32_1 = arith.constant 0 : i32
    return %c0_i32, %c0_i32_0 : i32, i32
  }
  func.func @transform_9(%arg0: i32) -> (i32, i32) {
    %c0_i32 = arith.constant 0 : i32
    %c0_i32_0 = arith.constant 0 : i32
    %c0_i32_1 = arith.constant 0 : i32
    return %c0_i32, %c0_i32_0 : i32, i32
  }
  func.func @transform_10(%arg0: i32) -> (i32, i32) {
    %c0_i32 = arith.constant 0 : i32
    %c0_i32_0 = arith.constant 0 : i32
    %c0_i32_1 = arith.constant 0 : i32
    return %c0_i32, %c0_i32_0 : i32, i32
  }
  func.func @transform_11(%arg0: i32) -> (i32, i32) {
    %c0_i32 = arith.constant 0 : i32
    %c0_i32_0 = arith.constant 0 : i32
    %c0_i32_1 = arith.constant 0 : i32
    return %c0_i32, %c0_i32_0 : i32, i32
  }
  func.func @transform_12(%arg0: i32) -> (i32, i32) {
    %c0_i32 = arith.constant 0 : i32
    %c0_i32_0 = arith.constant 0 : i32
    return %arg0, %c0_i32 : i32, i32
  }
}

</mosaic_0001>

<bundles_post_ra>
// kernel: tpu_custom_call.1
= control target key start
LH: loop header
LB: loop body
LE: loop exit
PB: predicated region body
PF: predicated region fallthrough
CT: control target
= control target key end

     0   :  { %17 = vsyncpa [#allocation3], 0  ;;  %s2134_s0 = inlined_call_operand.hbm [shape: f32[8,128], index: 0, kind: input, shape index: {}]   ;;  %s2135_s1 = inlined_call_operand.hbm [shape: f32[8,256], index: 1, kind: input, shape index: {}]   ;;  %s2136_s2 = inlined_call_operand.hbm [shape: f32[128,128], index: 2, kind: input, shape index: {}]   ;;  %s2137_s3 = inlined_call_operand.vmem [shape: f32[1,128], index: 3, kind: input, shape index: {}]   ;;  %s2138_s4 = inlined_call_operand.hbm [shape: f32[256,128], index: 4, kind: input, shape index: {}]   ;;  %s2139_s5 = inlined_call_operand.vmem [shape: f32[1,128], index: 5, kind: input, shape index: {}]   ;;  %s2140_s6 = inlined_call_operand.hbm [shape: f32[256,768], index: 6, kind: input, shape index: {}]   ;;  %s2141_s7 = inlined_call_operand.vmem [shape: f32[1,768], index: 7, kind: input, shape index: {}]   ;;  %s2142_s8 = inlined_call_operand.hbm [shape: f32[512,128], index: 8, kind: input, shape index: {}]   ;;  %s2143_s9 = inlined_call_operand.vmem [shape: f32[1,128], index: 9, kind: input, shape index: {}]   ;;  %s2144_s10 = inlined_call_operand.hbm [shape: f32[256,128], index: 10, kind: input, shape index: {}]   ;;  %s2145_s11 = inlined_call_operand.vmem [shape: f32[1,128], index: 11, kind: input, shape index: {}]   ;;  %s2146_s12 = inlined_call_operand.hbm [shape: f32[8,128], index: 12, kind: output, shape index: {}]  }
   0x1   :  { %18 = vsyncpa [#allocation6], 0 }
   0x2   :  { %19 = vsyncpa [#allocation9], 0 }
   0x3   :  { %20 = vsyncpa [#allocation12], 0 }
   0x4   :  { %21 = vsyncpa [#allocation4], 0  ;;  %s1891_s21 = smov [#allocation5]   ;;  %s1705_s25 = scalar_lea.hbm %s2135_s1, 256 }
   0x5   :  { %s38_s22 = sshll.u32 %s1891_s21, 4  ;;  %p1706_p0 = scmp.ne.s32.totalorder %s2135_s1, %s1705_s25  ;;  %s39_s22 = int_to_ptr.vmem [resolvable:$true] %s38_s22 }
   0x6   :  { %p1709_p1 = scmp.lt.u32.totalorder %s1705_s25, %s2135_s1 }
   0x8   :  { %p1711_p2 = pnand %p1709_p1, %p1706_p0 }
   0xa   :  { %1714 = shalt.err (!%p1711_p2)
}
   0xb   :  { %s1715_s30 = scalar_lea.vmem %s39_s22, 256  ;;  %p1720_p4 = scmp.lt.s32.totalorder %s39_s22, %s39_s22 }
   0xc   :  { %p1716_p3 = scmp.ne.s32.totalorder %s39_s22, %s1715_s30  ;;  %p1721_p5 = scmp.lt.s32.totalorder %s1715_s30, %s1715_s30 }
   0xe   :  { %p1722_p6 = por %p1721_p5, %p1720_p4 }
  0x10   :  { %p1723_p7 = pnand %p1722_p6, %p1716_p3 }
  0x12   :  { %1726 = shalt.err (!%p1723_p7)
}
  0x13   :  { %41 = dma.hbm_to_vmem [thread:$0]  %s2135_s1, 256, %s39_s22, [#allocation6]  }
  0x14   :  { %s1892_s15 = smov [#allocation8]   ;;  %s1893_s17 = smov [#allocation11]  }
  0x15   :  { %s61_s16 = sshll.u32 %s1892_s15, 4  ;;  %s89_s18 = sshll.u32 %s1893_s17, 4  ;;  %s62_s16 = int_to_ptr.vmem [resolvable:$true] %s61_s16  ;;  %s90_s18 = int_to_ptr.vmem [resolvable:$true] %s89_s18 }
  0x16   :  { %s1727_s21 = scalar_lea.hbm %s2138_s4, 4096 }
  0x17   :  { %p1728_p8 = scmp.ne.s32.totalorder %s2138_s4, %s1727_s21  ;;  %p1731_p9 = scmp.lt.u32.totalorder %s1727_s21, %s2138_s4 }
  0x19   :  { %p1733_p10 = pnand %p1731_p9, %p1728_p8 }
  0x1b   :  { %1736 = shalt.err (!%p1733_p10)
}
  0x1c   :  { %s1737_s1 = scalar_lea.vmem %s62_s16, 4096  ;;  %p1742_p12 = scmp.lt.s32.totalorder %s62_s16, %s62_s16 }
  0x1d   :  { %p1738_p11 = scmp.ne.s32.totalorder %s62_s16, %s1737_s1  ;;  %p1743_p13 = scmp.lt.s32.totalorder %s1737_s1, %s1737_s1 }
  0x1f   :  { %p1744_p0 = por %p1743_p13, %p1742_p12 }
  0x21   :  { %p1745_p1 = pnand %p1744_p0, %p1738_p11 }
  0x23   :  { %1748 = shalt.err (!%p1745_p1)
}
  0x24   :  { %s1894_s22 = smov 128   ;;  %s1895_s27 = smov 8  }
  0x25   :  { %67 = dma.hbm_to_vmem [thread:$0]  %s2138_s4, 4096, %s62_s16, [#allocation9], %s1894_s22, %s1894_s22, %s1895_s27  }
  0x26   :  { %s1749_s14 = scalar_lea.hbm %s2142_s8, 8192 }
  0x27   :  { %p1750_p2 = scmp.ne.s32.totalorder %s2142_s8, %s1749_s14  ;;  %p1753_p3 = scmp.lt.u32.totalorder %s1749_s14, %s2142_s8 }
  0x29   :  { %p1755_p4 = pnand %p1753_p3, %p1750_p2 }
  0x2b   :  { %1758 = shalt.err (!%p1755_p4)
}
  0x2c   :  { %s1759_s21 = scalar_lea.vmem %s90_s18, 8192  ;;  %p1764_p6 = scmp.lt.s32.totalorder %s90_s18, %s90_s18 }
  0x2d   :  { %p1760_p5 = scmp.ne.s32.totalorder %s90_s18, %s1759_s21  ;;  %p1765_p7 = scmp.lt.s32.totalorder %s1759_s21, %s1759_s21 }
  0x2f   :  { %p1766_p8 = por %p1765_p7, %p1764_p6 }
  0x31   :  { %p1767_p9 = pnand %p1766_p8, %p1760_p5 }
  0x33   :  { %1770 = shalt.err (!%p1767_p9)
}
  0x34   :  { %95 = dma.hbm_to_vmem [thread:$0]  %s2142_s8, 8192, %s90_s18, [#allocation12], %s1894_s22, %s1894_s22, %s1895_s27  }
  0x35   :  { %s1896_s23 = smov [#allocation2]   ;;  %s1897_s25 = smov [#allocation7]  }
  0x36   :  { %s28_s24 = sshll.u32 %s1896_s23, 4  ;;  %s47_s26 = sshll.u32 %s1897_s25, 4  ;;  %s29_s24 = int_to_ptr.vmem [resolvable:$true] %s28_s24  ;;  %s48_s26 = int_to_ptr.vmem [resolvable:$true] %s47_s26 }
  0x37   :  { %s1771_s29 = scalar_lea.hbm %s2134_s0, 128 }
  0x38   :  { %p1772_p10 = scmp.ne.s32.totalorder %s2134_s0, %s1771_s29  ;;  %p1775_p11 = scmp.lt.u32.totalorder %s1771_s29, %s2134_s0 }
  0x3a   :  { %p1777_p12 = pnand %p1775_p11, %p1772_p10 }
  0x3c   :  { %1780 = shalt.err (!%p1777_p12)
}
  0x3d   :  { %s1781_s8 = scalar_lea.vmem %s29_s24, 128  ;;  %p1786_p0 = scmp.lt.s32.totalorder %s29_s24, %s29_s24 }
  0x3e   :  { %p1782_p13 = scmp.ne.s32.totalorder %s29_s24, %s1781_s8  ;;  %p1787_p1 = scmp.lt.s32.totalorder %s1781_s8, %s1781_s8 }
  0x40   :  { %p1788_p2 = por %p1787_p1, %p1786_p0 }
  0x42   :  { %p1789_p3 = pnand %p1788_p2, %p1782_p13 }
  0x44   :  { %1792 = shalt.err (!%p1789_p3)
}
  0x45   :  { %31 = dma.hbm_to_vmem [thread:$0]  %s2134_s0, 128, %s29_s24, [#allocation3]  }
  0x46   :  { %s1793_s21 = scalar_lea.hbm %s2136_s2, 2048 }
  0x47   :  { %p1794_p4 = scmp.ne.s32.totalorder %s2136_s2, %s1793_s21  ;;  %p1797_p5 = scmp.lt.u32.totalorder %s1793_s21, %s2136_s2 }
  0x49   :  { %p1799_p6 = pnand %p1797_p5, %p1794_p4 }
  0x4b   :  { %1802 = shalt.err (!%p1799_p6)
}
  0x4c   :  { %s1803_s1 = scalar_lea.vmem %s48_s26, 2048  ;;  %p1808_p8 = scmp.lt.s32.totalorder %s48_s26, %s48_s26 }
  0x4d   :  { %p1804_p7 = scmp.ne.s32.totalorder %s48_s26, %s1803_s1  ;;  %p1809_p9 = scmp.lt.s32.totalorder %s1803_s1, %s1803_s1 }
  0x4f   :  { %p1810_p10 = por %p1809_p9, %p1808_p8 }
  0x51   :  { %p1811_p11 = pnand %p1810_p10, %p1804_p7 }
  0x53   :  { %1814 = shalt.err (!%p1811_p11)
}
  0x54   :  { %53 = dma.hbm_to_vmem [thread:$0]  %s2136_s2, 2048, %s48_s26, [#allocation6], %s1894_s22, %s1894_s22, %s1895_s27  }
  0x55   :  { %s1898_s28 = smov [#allocation10]   ;;  %s1815_s14 = scalar_lea.hbm %s2140_s6, 24576 }
  0x56   :  { %s75_s29 = sshll.u32 %s1898_s28, 4  ;;  %p1816_p12 = scmp.ne.s32.totalorder %s2140_s6, %s1815_s14  ;;  %s76_s29 = int_to_ptr.vmem [resolvable:$true] %s75_s29 }
  0x57   :  { %p1819_p13 = scmp.lt.u32.totalorder %s1815_s14, %s2140_s6 }
  0x59   :  { %p1821_p0 = pnand %p1819_p13, %p1816_p12 }
  0x5b   :  { %1824 = shalt.err (!%p1821_p0)
}
  0x5c   :  { %s1825_s19 = scalar_lea.vmem %s76_s29, 24576  ;;  %p1830_p2 = scmp.lt.s32.totalorder %s76_s29, %s76_s29 }
  0x5d   :  { %p1826_p1 = scmp.ne.s32.totalorder %s76_s29, %s1825_s19  ;;  %p1831_p3 = scmp.lt.s32.totalorder %s1825_s19, %s1825_s19 }
  0x5f   :  { %p1832_p4 = por %p1831_p3, %p1830_p2 }
  0x61   :  { %p1833_p5 = pnand %p1832_p4, %p1826_p1 }
  0x63   :  { %1836 = shalt.err (!%p1833_p5)
}
  0x64   :  { %s1899_s2 = smov 768   ;;  %s1900_s26 = smov 48  }
  0x65   :  { %81 = dma.hbm_to_vmem [thread:$0]  %s2140_s6, 24576, %s76_s29, [#allocation9], %s1899_s2, %s1899_s2, %s1900_s26  }
  0x66   :  { %s1901_s4 = smov [#allocation13]   ;;  %s1837_s1 = scalar_lea.hbm %s2144_s10, 4096 }
  0x67   :  { %s103_s16 = sshll.u32 %s1901_s4, 4  ;;  %p1838_p6 = scmp.ne.s32.totalorder %s2144_s10, %s1837_s1  ;;  %s104_s16 = int_to_ptr.vmem [resolvable:$true] %s103_s16 }
  0x68   :  { %p1841_p7 = scmp.lt.u32.totalorder %s1837_s1, %s2144_s10 }
  0x6a   :  { %p1843_p8 = pnand %p1841_p7, %p1838_p6 }
  0x6c   :  { %1846 = shalt.err (!%p1843_p8)
}
  0x6d   :  { %s1847_s13 = scalar_lea.vmem %s104_s16, 4096  ;;  %p1852_p10 = scmp.lt.s32.totalorder %s104_s16, %s104_s16 }
  0x6e   :  { %p1848_p9 = scmp.ne.s32.totalorder %s104_s16, %s1847_s13  ;;  %p1853_p11 = scmp.lt.s32.totalorder %s1847_s13, %s1847_s13 }
  0x70   :  { %p1854_p12 = por %p1853_p11, %p1852_p10 }
  0x72   :  { %p1855_p13 = pnand %p1854_p12, %p1848_p9 }
  0x74   :  { %1858 = shalt.err (!%p1855_p13)
}
  0x75   :  { %109 = dma.hbm_to_vmem [thread:$0]  %s2144_s10, 4096, %s104_s16, [#allocation12], %s1894_s22, %s1894_s22, %s1895_s27  }
  0x76   :  { %1881 = dma.done.wait [#allocation3], 128  }
  0x77   :  { %1882 = vsyncadd [#allocation3], 4294967168 }
  0x78   :  { %1883 = dma.done.wait [#allocation6], 2304  }
  0x79   :  { %1884 = vsyncadd [#allocation6], 4294964992 }
  0x7a   :  { %1885 = dma.done.wait [#allocation9], 28672  }
  0x7b   :  { %1886 = vsyncadd [#allocation9], 4294938624 }
  0x7c   :  { %1887 = dma.done.wait [#allocation12], 12288  }
  0x7d   :  { %1888 = vsyncadd [#allocation12], 4294955008  ;;  %v1902_v0 = vmov 0.0|0.0   ;;  %vm1903_vm0 = vmmov 0   ;;  %v1904_v1 = vmov 0.0   ;;  %v245_v2 = vld [vmem:[#allocation8 + $0x80] sm:$0xff] }
  0x7e   :  { %1338 = vmatprep.subr.bf16.mxu0 %v1902_v0  ;;  %1335 = vmatprep.mubr.msk.f32.mxu0 %vm1903_vm0, %v1904_v1  ;;  %v246_v3 = vld [vmem:[#allocation8 + $0x88] sm:$0xff]  ;;  %v229_v4 = vld [vmem:[#allocation8] sm:$0xff]  ;;  %v247_v11 = vld [vmem:[#allocation8 + $0x90] sm:$0xff] }
  0x7f   :  { %v1362_v5 = vpack.c.bf16 %v246_v3, %v245_v2  ;;  %v230_v6 = vld [vmem:[#allocation8 + $0x8] sm:$0xff]  ;;  %v136_v7 = vld [vmem:[#allocation7] sm:$0xff]  ;;  %v248_v12 = vld [vmem:[#allocation8 + $0x98] sm:$0xff] }
  0x80   :  { %v137_v8 = vld [vmem:[#allocation7 + $0x8] sm:$0xff]  ;;  %v1364_v9 = vpack.c.bf16 %v230_v6, %v229_v4  ;;  %v231_v13 = vld [vmem:[#allocation8 + $0x10] sm:$0xff]  ;;  %v1366_v14 = vpack.c.bf16 %v248_v12, %v247_v11  ;;  %v232_v15 = vld [vmem:[#allocation8 + $0x18] sm:$0xff] }
  0x81   :  { %v1339_v10 = vpack.c.bf16 %v137_v8, %v136_v7  ;;  %1363 = vmatprep.subr.bf16.mxu1 %v1362_v5  ;;  %v138_v16 = vld [vmem:[#allocation7 + $0x10] sm:$0xff]  ;;  %v139_v17 = vld [vmem:[#allocation7 + $0x18] sm:$0xff]  ;;  %v1368_v18 = vpack.c.bf16 %v232_v15, %v231_v13  ;;  %v249_v20 = vld [vmem:[#allocation8 + $0xa0] sm:$0xff] }
  0x82   :  { %1365 = vmatpush3.bf16.msra.mxu1 %v1364_v9  ;;  %v1342_v19 = vpack.c.bf16 %v139_v17, %v138_v16  ;;  %v250_v21 = vld [vmem:[#allocation8 + $0xa8] sm:$0xff]  ;;  %v233_v22 = vld [vmem:[#allocation8 + $0x20] sm:$0xff]  ;;  %v251_v27 = vld [vmem:[#allocation8 + $0xb0] sm:$0xff] }
  0x83   :  { %1340 = vmatpush3.bf16.msra.mxu0 %v1339_v10  ;;  %1367 = vmatprep.subr.bf16.mxu1 %v1366_v14  ;;  %v1370_v23 = vpack.c.bf16 %v250_v21, %v249_v20  ;;  %v234_v24 = vld [vmem:[#allocation8 + $0x28] sm:$0xff]  ;;  %v140_v25 = vld [vmem:[#allocation7 + $0x20] sm:$0xff]  ;;  %v252_v28 = vld [vmem:[#allocation8 + $0xb8] sm:$0xff] }
  0x84   :  { %1341 = vmatprep.subr.bf16.mxu0 %v1902_v0  ;;  %v141_v26 = vld [vmem:[#allocation7 + $0x28] sm:$0xff]  ;;  %v1372_v29 = vpack.c.bf16 %v234_v24, %v233_v22  ;;  %v235_v31 = vld [vmem:[#allocation8 + $0x30] sm:$0xff]  ;;  %v1374_v32 = vpack.c.bf16 %v252_v28, %v251_v27  ;;  %v236_v33 = vld [vmem:[#allocation8 + $0x38] sm:$0xff] }
  0x85   :  { %v1345_v30 = vpack.c.bf16 %v141_v26, %v140_v25  ;;  %v142_v34 = vld [vmem:[#allocation7 + $0x30] sm:$0xff]  ;;  %v143_v35 = vld [vmem:[#allocation7 + $0x38] sm:$0xff]  ;;  %v253_v36 = vld [vmem:[#allocation8 + $0xc0] sm:$0xff]  ;;  %v1376_v38 = vpack.c.bf16 %v236_v33, %v235_v31 }
  0x86   :  { %1369 = vmatpush3.bf16.msra.mxu1 %v1368_v18  ;;  %v254_v37 = vld [vmem:[#allocation8 + $0xc8] sm:$0xff]  ;;  %v1348_v39 = vpack.c.bf16 %v143_v35, %v142_v34  ;;  %v237_v40 = vld [vmem:[#allocation8 + $0x40] sm:$0xff]  ;;  %v255_v45 = vld [vmem:[#allocation8 + $0xd0] sm:$0xff] }
  0x87   :  { %1343 = vmatpush3.bf16.msra.mxu0 %v1342_v19  ;;  %1371 = vmatprep.subr.bf16.mxu1 %v1370_v23  ;;  %v1378_v41 = vpack.c.bf16 %v254_v37, %v253_v36  ;;  %v238_v42 = vld [vmem:[#allocation8 + $0x48] sm:$0xff]  ;;  %v144_v43 = vld [vmem:[#allocation7 + $0x40] sm:$0xff]  ;;  %v256_v46 = vld [vmem:[#allocation8 + $0xd8] sm:$0xff] }
  0x88   :  { %1344 = vmatprep.subr.bf16.mxu0 %v1902_v0  ;;  %v145_v44 = vld [vmem:[#allocation7 + $0x48] sm:$0xff]  ;;  %v135_v47 = vld [vmem:[#allocation5 + $0x8] sm:$0xff]  ;;  %v1380_v48 = vpack.c.bf16 %v238_v42, %v237_v40  ;;  %v239_v50 = vld [vmem:[#allocation8 + $0x50] sm:$0xff]  ;;  %v1382_v51 = vpack.c.bf16 %v256_v46, %v255_v45 }
  0x89   :  { %v1351_v49 = vpack.c.bf16 %v145_v44, %v144_v43  ;;  %v240_v52 = vld [vmem:[#allocation8 + $0x58] sm:$0xff]  ;;  %v146_v53 = vld [vmem:[#allocation7 + $0x50] sm:$0xff]  ;;  %v257_v55 = vld [vmem:[#allocation8 + $0xe0] sm:$0xff]  ;;  %332 = vmatprep.mubr.f32.mxu1 %v135_v47 }
  0x8a   :  { %1373 = vmatpush3.bf16.msra.mxu1 %v1372_v29  ;;  %v147_v54 = vld [vmem:[#allocation7 + $0x58] sm:$0xff]  ;;  %v258_v56 = vld [vmem:[#allocation8 + $0xe8] sm:$0xff]  ;;  %v1384_v57 = vpack.c.bf16 %v240_v52, %v239_v50  ;;  %v241_v59 = vld [vmem:[#allocation8 + $0x60] sm:$0xff] }
  0x8b   :  { %1346 = vmatpush3.bf16.msra.mxu0 %v1345_v30  ;;  %1375 = vmatprep.subr.bf16.mxu1 %v1374_v32  ;;  %v1354_v58 = vpack.c.bf16 %v147_v54, %v146_v53  ;;  %v1386_v60 = vpack.c.bf16 %v258_v56, %v257_v55  ;;  %v242_v61 = vld [vmem:[#allocation8 + $0x68] sm:$0xff]  ;;  %v148_v62 = vld [vmem:[#allocation7 + $0x60] sm:$0xff]  ;;  %v259_v1 = vld [vmem:[#allocation8 + $0xf0] sm:$0xff] }
  0x8c   :  { %1347 = vmatprep.subr.bf16.mxu0 %v1902_v0  ;;  %v149_v63 = vld [vmem:[#allocation7 + $0x68] sm:$0xff]  ;;  %v260_v2 = vld [vmem:[#allocation8 + $0xf8] sm:$0xff]  ;;  %v1388_v3 = vpack.c.bf16 %v242_v61, %v241_v59  ;;  %v243_v5 = vld [vmem:[#allocation8 + $0x70] sm:$0xff] }
  0x8d   :  { %v1357_v4 = vpack.c.bf16 %v149_v63, %v148_v62  ;;  %v244_v6 = vld [vmem:[#allocation8 + $0x78] sm:$0xff]  ;;  %v1390_v7 = vpack.c.bf16 %v260_v2, %v259_v1  ;;  %v150_v8 = vld [vmem:[#allocation7 + $0x70] sm:$0xff]  ;;  %v339_v10 = vld [vmem:[#allocation10 + $0x8] sm:$0xff] }
  0x8e   :  { %1377 = vmatpush3.bf16.msra.mxu1 %v1376_v38  ;;  %v151_v9 = vld [vmem:[#allocation7 + $0x78] sm:$0xff]  ;;  %v347_v13 = vld [vmem:[#allocation10 + $0x48] sm:$0xff]  ;;  %v1392_v14 = vpack.c.bf16 %v244_v6, %v243_v5  ;;  %v338_v16 = vld [vmem:[#allocation10] sm:$0xff] }
  0x8f   :  { %1349 = vmatpush3.bf16.msra.mxu0 %v1348_v39  ;;  %1379 = vmatprep.subr.bf16.mxu1 %v1378_v41  ;;  %v345_v11 = vld [vmem:[#allocation10 + $0x38] sm:$0xff]  ;;  %v1360_v15 = vpack.c.bf16 %v151_v9, %v150_v8  ;;  %v344_v17 = vld [vmem:[#allocation10 + $0x30] sm:$0xff]  ;;  %v346_v21 = vld [vmem:[#allocation10 + $0x40] sm:$0xff] }
  0x90   :  { %1350 = vmatprep.subr.bf16.mxu0 %v1902_v0  ;;  %v341_v12 = vld [vmem:[#allocation10 + $0x18] sm:$0xff]  ;;  %v1394_v18 = vpack.c.bf16 %v345_v11, %v339_v10  ;;  %v340_v20 = vld [vmem:[#allocation10 + $0x10] sm:$0xff]  ;;  %v351_v22 = vld [vmem:[#allocation10 + $0x68] sm:$0xff]  ;;  %v1396_v28 = vpack.c.bf16 %v344_v17, %v338_v16 }
  0x91   :  { %v1458_v19 = vpack.c.bf16 %v347_v13, %v341_v12  ;;  %v357_v23 = vld [vmem:[#allocation10 + $0x98] sm:$0xff]  ;;  %v359_v25 = vld [vmem:[#allocation10 + $0xa8] sm:$0xff]  ;;  %v134_v26 = vld [vmem:[#allocation5] sm:$0xff]  ;;  %v1460_v29 = vpack.c.bf16 %v346_v21, %v340_v20 }
  0x92   :  { %1381 = vmatpush3.bf16.msra.mxu1 %v1380_v48  ;;  %v353_v24 = vld [vmem:[#allocation10 + $0x78] sm:$0xff]  ;;  %v133_v27 = vld [vmem:[#allocation2] sm:$0xff]  ;;  %v350_v30 = vld [vmem:[#allocation10 + $0x60] sm:$0xff]  ;;  %v1398_v32 = vpack.c.bf16 %v357_v23, %v351_v22 }
  0x93   :  { %1352 = vmatpush3.bf16.msra.mxu0 %v1351_v49  ;;  %1383 = vmatprep.subr.bf16.mxu1 %v1382_v51  ;;  %v356_v31 = vld [vmem:[#allocation10 + $0x90] sm:$0xff]  ;;  %v358_v34 = vld [vmem:[#allocation10 + $0xa0] sm:$0xff]  ;;  %v363_v35 = vld [vmem:[#allocation10 + $0xc8] sm:$0xff] }
  0x94   :  { %1353 = vmatprep.subr.bf16.mxu0 %v1902_v0  ;;  %v352_v33 = vld [vmem:[#allocation10 + $0x70] sm:$0xff]  ;;  %v369_v36 = vld [vmem:[#allocation10 + $0xf8] sm:$0xff]  ;;  %v371_v38 = vld [vmem:[#allocation10 + $0x108] sm:$0xff]  ;;  %v1400_v39 = vpack.c.bf16 %v356_v31, %v350_v30 }
  0x95   :  { %v365_v37 = vld [vmem:[#allocation10 + $0xd8] sm:$0xff]  ;;  %v1464_v40 = vpack.c.bf16 %v358_v34, %v352_v33  ;;  %v362_v41 = vld [vmem:[#allocation10 + $0xc0] sm:$0xff]  ;;  %v368_v42 = vld [vmem:[#allocation10 + $0xf0] sm:$0xff]  ;;  %v1402_v43 = vpack.c.bf16 %v369_v36, %v363_v35 }
  0x96   :  { %1385 = vmatpush3.bf16.msra.mxu1 %v1384_v57  ;;  %v1466_v44 = vpack.c.bf16 %v371_v38, %v365_v37  ;;  %v364_v45 = vld [vmem:[#allocation10 + $0xd0] sm:$0xff]  ;;  %v370_v46 = vld [vmem:[#allocation10 + $0x100] sm:$0xff]  ;;  %v375_v47 = vld [vmem:[#allocation10 + $0x128] sm:$0xff]  ;;  %v1404_v51 = vpack.c.bf16 %v368_v42, %v362_v41 }
  0x97   :  { %1355 = vmatpush3.bf16.msra.mxu0 %v1354_v58  ;;  %1387 = vmatprep.subr.bf16.mxu1 %v1386_v60  ;;  %v381_v48 = vld [vmem:[#allocation10 + $0x158] sm:$0xff]  ;;  %v383_v50 = vld [vmem:[#allocation10 + $0x168] sm:$0xff]  ;;  %v1468_v52 = vpack.c.bf16 %v370_v46, %v364_v45  ;;  %v374_v53 = vld [vmem:[#allocation10 + $0x120] sm:$0xff] }
  0x98   :  { %1356 = vmatprep.subr.bf16.mxu0 %v1902_v0  ;;  %v377_v49 = vld [vmem:[#allocation10 + $0x138] sm:$0xff]  ;;  %v380_v54 = vld [vmem:[#allocation10 + $0x150] sm:$0xff]  ;;  %v1406_v55 = vpack.c.bf16 %v381_v48, %v375_v47  ;;  %v382_v58 = vld [vmem:[#allocation10 + $0x160] sm:$0xff] }
  0x99   :  { %v1470_v56 = vpack.c.bf16 %v383_v50, %v377_v49  ;;  %v376_v57 = vld [vmem:[#allocation10 + $0x130] sm:$0xff]  ;;  %v387_v59 = vld [vmem:[#allocation10 + $0x188] sm:$0xff]  ;;  %v393_v60 = vld [vmem:[#allocation10 + $0x1b8] sm:$0xff]  ;;  %v1408_v63 = vpack.c.bf16 %v380_v54, %v374_v53 }
  0x9a   :  { %1389 = vmatpush3.bf16.msra.mxu1 %v1388_v3  ;;  %v389_v61 = vld [vmem:[#allocation10 + $0x198] sm:$0xff]  ;;  %v395_v62 = vld [vmem:[#allocation10 + $0x1c8] sm:$0xff]  ;;  %v1472_v1 = vpack.c.bf16 %v382_v58, %v376_v57  ;;  %v386_v2 = vld [vmem:[#allocation10 + $0x180] sm:$0xff] }
  0x9b   :  { %1358 = vmatpush3.bf16.msra.mxu0 %v1357_v4  ;;  %1391 = vmatprep.subr.bf16.mxu1 %v1390_v7  ;;  %v392_v3 = vld [vmem:[#allocation10 + $0x1b0] sm:$0xff]  ;;  %v1410_v4 = vpack.c.bf16 %v393_v60, %v387_v59  ;;  %v1474_v5 = vpack.c.bf16 %v395_v62, %v389_v61  ;;  %v394_v7 = vld [vmem:[#allocation10 + $0x1c0] sm:$0xff]  ;;  %v399_v8 = vld [vmem:[#allocation10 + $0x1e8] sm:$0xff] }
  0x9c   :  { %1359 = vmatprep.subr.bf16.mxu0 %v1902_v0  ;;  %v1462_v0 = vpack.c.bf16 %v359_v25, %v353_v24  ;;  %v388_v6 = vld [vmem:[#allocation10 + $0x190] sm:$0xff]  ;;  %v405_v9 = vld [vmem:[#allocation10 + $0x218] sm:$0xff]  ;;  %v407_v11 = vld [vmem:[#allocation10 + $0x228] sm:$0xff]  ;;  %v1412_v12 = vpack.c.bf16 %v392_v3, %v386_v2 }
  0x9d   :  { %v401_v10 = vld [vmem:[#allocation10 + $0x1f8] sm:$0xff]  ;;  %v1476_v13 = vpack.c.bf16 %v394_v7, %v388_v6  ;;  %v1414_v16 = vpack.c.bf16 %v405_v9, %v399_v8  ;;  %v411_v20 = vld [vmem:[#allocation10 + $0x248] sm:$0xff]  ;;  %v412_v30 = vld [vmem:[#allocation10 + $0x250] sm:$0xff] }
  0x9e   :  { %1393 = vmatpush3.bf16.msra.mxu1 %v1392_v14  ;;  %v398_v14 = vld [vmem:[#allocation10 + $0x1e0] sm:$0xff]  ;;  %v1478_v17 = vpack.c.bf16 %v407_v11, %v401_v10  ;;  %v417_v21 = vld [vmem:[#allocation10 + $0x278] sm:$0xff]  ;;  %v419_v23 = vld [vmem:[#allocation10 + $0x288] sm:$0xff] }
  0x9f   :  { %1361 = vmatpush3.bf16.msra.mxu0 %v1360_v15  ;;  %1459 = vmatprep.subr.bf16.mxu1 %v1458_v19  ;;  %v404_v15 = vld [vmem:[#allocation10 + $0x210] sm:$0xff]  ;;  %v406_v19 = vld [vmem:[#allocation10 + $0x220] sm:$0xff]  ;;  %v413_v22 = vld [vmem:[#allocation10 + $0x258] sm:$0xff] }
  0xa0   :  { %1395 = vmatprep.subr.bf16.mxu0 %v1394_v18  ;;  %v400_v18 = vld [vmem:[#allocation10 + $0x1f0] sm:$0xff]  ;;  %v1416_v24 = vpack.c.bf16 %v404_v15, %v398_v14  ;;  %v418_v31 = vld [vmem:[#allocation10 + $0x280] sm:$0xff]  ;;  %v425_v33 = vld [vmem:[#allocation10 + $0x2b8] sm:$0xff] }
  0xa1   :  { %333 = vmatmul.mubr.f32.vlgmr.msra.gmra.mrb[0].mxu1 %v134_v26  ;;  %v1480_v25 = vpack.c.bf16 %v406_v19, %v400_v18  ;;  %v410_v26 = vld [vmem:[#allocation10 + $0x240] sm:$0xff]  ;;  %v431_v34 = vld [vmem:[#allocation10 + $0x2e8] sm:$0xff]  ;;  %v1484_v36 = vpack.c.bf16 %v418_v31, %v412_v30  ;;  %v428_v38 = vld [vmem:[#allocation10 + $0x2d0] sm:$0xff] }
  0xa2   :  { %1336 = vmatmul.mubr.f32.vlgmr.msra.gmra.mrb[0].mxu0 %v133_v27  ;;  %1461 = vmatpush1.bf16.msra.mxu1 %v1460_v29  ;;  %v416_v27 = vld [vmem:[#allocation10 + $0x270] sm:$0xff]  ;;  %v1482_v29 = vpack.c.bf16 %v419_v23, %v413_v22  ;;  %v422_v37 = vld [vmem:[#allocation10 + $0x2a0] sm:$0xff]  ;;  %v437_v45 = vld [vmem:[#allocation10 + $0x318] sm:$0xff] }
  0xa3   :  { %1397 = vmatpush1.bf16.msra.mxu0 %v1396_v28  ;;  %1463 = vmatprep.subr.bf16.mxu1 %v1462_v0  ;;  %v1418_v28 = vpack.c.bf16 %v417_v21, %v411_v20  ;;  %v429_v0 = vld [vmem:[#allocation10 + $0x2d8] sm:$0xff]  ;;  %v1420_v35 = vpack.c.bf16 %v416_v27, %v410_v26  ;;  %v424_v41 = vld [vmem:[#allocation10 + $0x2b0] sm:$0xff]  ;;  %v430_v42 = vld [vmem:[#allocation10 + $0x2e0] sm:$0xff]  ;;  %v1424_v47 = vpack.c.bf16 %v428_v38, %v422_v37 }
  0xa4   :  { %1399 = vmatprep.subr.bf16.mxu0 %v1398_v32  ;;  %v423_v32 = vld [vmem:[#allocation10 + $0x2a8] sm:$0xff]  ;;  %v1488_v48 = vpack.c.bf16 %v430_v42, %v424_v41  ;;  %v434_v49 = vld [vmem:[#allocation10 + $0x300] sm:$0xff]  ;;  %v440_v50 = vld [vmem:[#allocation10 + $0x330] sm:$0xff] }
  0xa5   :  { %v443_v46 = vld [vmem:[#allocation10 + $0x348] sm:$0xff]  ;;  %v436_v53 = vld [vmem:[#allocation10 + $0x310] sm:$0xff]  ;;  %v442_v54 = vld [vmem:[#allocation10 + $0x340] sm:$0xff]  ;;  %v1428_v59 = vpack.c.bf16 %v440_v50, %v434_v49 }
  0xa6   :  { %1465 = vmatpush1.bf16.msra.mxu1 %v1464_v40  ;;  %v1486_v40 = vpack.c.bf16 %v431_v34, %v425_v33  ;;  %v449_v57 = vld [vmem:[#allocation10 + $0x378] sm:$0xff]  ;;  %v455_v58 = vld [vmem:[#allocation10 + $0x3a8] sm:$0xff]  ;;  %v1492_v60 = vpack.c.bf16 %v442_v54, %v436_v53  ;;  %v446_v61 = vld [vmem:[#allocation10 + $0x360] sm:$0xff] }
  0xa7   :  { %1401 = vmatpush1.bf16.msra.mxu0 %v1400_v39  ;;  %1467 = vmatprep.subr.bf16.mxu1 %v1466_v44  ;;  %v1422_v39 = vpack.c.bf16 %v429_v0, %v423_v32  ;;  %v441_v44 = vld [vmem:[#allocation10 + $0x338] sm:$0xff]  ;;  %v452_v62 = vld [vmem:[#allocation10 + $0x390] sm:$0xff]  ;;  %v454_v3 = vld [vmem:[#allocation10 + $0x3a0] sm:$0xff] }
  0xa8   :  { %1403 = vmatprep.subr.bf16.mxu0 %v1402_v43  ;;  %v435_v43 = vld [vmem:[#allocation10 + $0x308] sm:$0xff]  ;;  %v448_v2 = vld [vmem:[#allocation10 + $0x370] sm:$0xff]  ;;  %v461_v6 = vld [vmem:[#allocation10 + $0x3d8] sm:$0xff]  ;;  %v1432_v8 = vpack.c.bf16 %v452_v62, %v446_v61 }
  0xa9   :  { %v467_v7 = vld [vmem:[#allocation10 + $0x408] sm:$0xff]  ;;  %v1496_v9 = vpack.c.bf16 %v454_v3, %v448_v2  ;;  %v458_v10 = vld [vmem:[#allocation10 + $0x3c0] sm:$0xff]  ;;  %v464_v11 = vld [vmem:[#allocation10 + $0x3f0] sm:$0xff] }
  0xaa   :  { %1469 = vmatpush1.bf16.msra.mxu1 %v1468_v52  ;;  %v1490_v52 = vpack.c.bf16 %v443_v46, %v437_v45  ;;  %v460_v14 = vld [vmem:[#allocation10 + $0x3d0] sm:$0xff]  ;;  %v466_v15 = vld [vmem:[#allocation10 + $0x400] sm:$0xff]  ;;  %v473_v18 = vld [vmem:[#allocation10 + $0x438] sm:$0xff]  ;;  %v1436_v20 = vpack.c.bf16 %v464_v11, %v458_v10 }
  0xab   :  { %1405 = vmatpush1.bf16.msra.mxu0 %v1404_v51  ;;  %1471 = vmatprep.subr.bf16.mxu1 %v1470_v56  ;;  %v1426_v51 = vpack.c.bf16 %v441_v44, %v435_v43  ;;  %v453_v56 = vld [vmem:[#allocation10 + $0x398] sm:$0xff]  ;;  %v479_v19 = vld [vmem:[#allocation10 + $0x468] sm:$0xff]  ;;  %v1500_v21 = vpack.c.bf16 %v466_v15, %v460_v14  ;;  %v470_v22 = vld [vmem:[#allocation10 + $0x420] sm:$0xff] }
  0xac   :  { %1407 = vmatprep.subr.bf16.mxu0 %v1406_v55  ;;  %v447_v55 = vld [vmem:[#allocation10 + $0x368] sm:$0xff]  ;;  %v476_v23 = vld [vmem:[#allocation10 + $0x450] sm:$0xff]  ;;  %v478_v27 = vld [vmem:[#allocation10 + $0x460] sm:$0xff] }
  0xad   :  { %v472_v26 = vld [vmem:[#allocation10 + $0x430] sm:$0xff]  ;;  %v485_v30 = vld [vmem:[#allocation10 + $0x498] sm:$0xff]  ;;  %v491_v31 = vld [vmem:[#allocation10 + $0x4c8] sm:$0xff]  ;;  %v1440_v32 = vpack.c.bf16 %v476_v23, %v470_v22 }
  0xae   :  { %1473 = vmatpush1.bf16.msra.mxu1 %v1472_v1  ;;  %v1494_v1 = vpack.c.bf16 %v455_v58, %v449_v57  ;;  %v1504_v0 = vpack.c.bf16 %v478_v27, %v472_v26  ;;  %v482_v33 = vld [vmem:[#allocation10 + $0x480] sm:$0xff]  ;;  %v488_v34 = vld [vmem:[#allocation10 + $0x4b0] sm:$0xff]  ;;  %v497_v41 = vld [vmem:[#allocation10 + $0x4f8] sm:$0xff] }
  0xaf   :  { %1409 = vmatpush1.bf16.msra.mxu0 %v1408_v63  ;;  %1475 = vmatprep.subr.bf16.mxu1 %v1474_v5  ;;  %v1430_v63 = vpack.c.bf16 %v453_v56, %v447_v55  ;;  %v465_v5 = vld [vmem:[#allocation10 + $0x3f8] sm:$0xff]  ;;  %v484_v37 = vld [vmem:[#allocation10 + $0x490] sm:$0xff]  ;;  %v490_v38 = vld [vmem:[#allocation10 + $0x4c0] sm:$0xff]  ;;  %v1444_v43 = vpack.c.bf16 %v488_v34, %v482_v33 }
  0xb0   :  { %1411 = vmatprep.subr.bf16.mxu0 %v1410_v4  ;;  %v459_v4 = vld [vmem:[#allocation10 + $0x3c8] sm:$0xff]  ;;  %v1508_v44 = vpack.c.bf16 %v490_v38, %v484_v37  ;;  %v494_v45 = vld [vmem:[#allocation10 + $0x4e0] sm:$0xff]  ;;  %v500_v46 = vld [vmem:[#allocation10 + $0x510] sm:$0xff] }
  0xb1   :  { %v503_v42 = vld [vmem:[#allocation10 + $0x528] sm:$0xff]  ;;  %v496_v49 = vld [vmem:[#allocation10 + $0x4f0] sm:$0xff]  ;;  %v502_v50 = vld [vmem:[#allocation10 + $0x520] sm:$0xff]  ;;  %v1448_v55 = vpack.c.bf16 %v500_v46, %v494_v45 }
  0xb2   :  { %1477 = vmatpush1.bf16.msra.mxu1 %v1476_v13  ;;  %v1498_v13 = vpack.c.bf16 %v467_v7, %v461_v6  ;;  %v509_v53 = vld [vmem:[#allocation10 + $0x558] sm:$0xff]  ;;  %v515_v54 = vld [vmem:[#allocation10 + $0x588] sm:$0xff]  ;;  %v1512_v56 = vpack.c.bf16 %v502_v50, %v496_v49  ;;  %v506_v58 = vld [vmem:[#allocation10 + $0x540] sm:$0xff] }
  0xb3   :  { %1413 = vmatpush1.bf16.msra.mxu0 %v1412_v12  ;;  %1479 = vmatprep.subr.bf16.mxu1 %v1478_v17  ;;  %v1434_v12 = vpack.c.bf16 %v465_v5, %v459_v4  ;;  %v477_v17 = vld [vmem:[#allocation10 + $0x458] sm:$0xff]  ;;  %v508_v62 = vld [vmem:[#allocation10 + $0x550] sm:$0xff]  ;;  %v519_v2 = vld [vmem:[#allocation10 + $0x5a8] sm:$0xff] }
  0xb4   :  { %1415 = vmatprep.subr.bf16.mxu0 %v1414_v16  ;;  %v471_v16 = vld [vmem:[#allocation10 + $0x428] sm:$0xff]  ;;  %v525_v3 = vld [vmem:[#allocation10 + $0x5d8] sm:$0xff]  ;;  %v518_v5 = vld [vmem:[#allocation10 + $0x5a0] sm:$0xff] }
  0xb5   :  { %v1454_v4 = vpack.c.bf16 %v525_v3, %v519_v2  ;;  %v524_v6 = vld [vmem:[#allocation10 + $0x5d0] sm:$0xff]  ;;  %v343_v14 = vld [vmem:[#allocation10 + $0x28] sm:$0xff]  ;;  %v349_v15 = vld [vmem:[#allocation10 + $0x58] sm:$0xff] }
  0xb6   :  { %1481 = vmatpush1.bf16.msra.mxu1 %v1480_v25  ;;  %v1502_v25 = vpack.c.bf16 %v479_v19, %v473_v18  ;;  %v1456_v7 = vpack.c.bf16 %v524_v6, %v518_v5  ;;  %v520_v10 = vld [vmem:[#allocation10 + $0x5b0] sm:$0xff]  ;;  %v798_v18 = vld [vmem:[#allocation11 + $0x88] sm:$0xff]  ;;  %v342_v26 = vld [vmem:[#allocation10 + $0x20] sm:$0xff] }
  0xb7   :  { %1417 = vmatpush1.bf16.msra.mxu0 %v1416_v24  ;;  %1483 = vmatprep.subr.bf16.mxu1 %v1482_v29  ;;  %v1438_v24 = vpack.c.bf16 %v477_v17, %v471_v16  ;;  %v489_v29 = vld [vmem:[#allocation10 + $0x4b8] sm:$0xff]  ;;  %v1522_v16 = vpack.c.bf16 %v349_v15, %v343_v14  ;;  %v797_v17 = vld [vmem:[#allocation11 + $0x80] sm:$0xff]  ;;  %v1140_v22 = vld [vmem:[%s2137_s3] ss:$0 sm:$0xff] }
  0xb8   :  { %1419 = vmatprep.subr.bf16.mxu0 %v1418_v28  ;;  %v483_v28 = vld [vmem:[#allocation10 + $0x488] sm:$0xff]  ;;  %v1586_v19 = vpack.c.bf16 %v798_v18, %v797_v17  ;;  %v348_v27 = vld [vmem:[#allocation10 + $0x50] sm:$0xff]  ;;  %v800_v34 = vld [vmem:[#allocation11 + $0x98] sm:$0xff] }
  0xb9   :  { %v799_v33 = vld [vmem:[#allocation11 + $0x90] sm:$0xff]  ;;  %v354_v38 = vld [vmem:[#allocation10 + $0x80] sm:$0xff]  ;;  %v784_v45 = vld [vmem:[#allocation11 + $0x18] sm:$0xff] }
  0xba   :  { %1485 = vmatpush1.bf16.msra.mxu1 %v1484_v36  ;;  %v1506_v36 = vpack.c.bf16 %v491_v31, %v485_v30  ;;  %v361_v30 = vld [vmem:[#allocation10 + $0xb8] sm:$0xff]  ;;  %v781_v31 = vld [vmem:[#allocation11] sm:$0xff]  ;;  %v787_v5 = vld [vmem:[#allocation11 + $0x30] sm:$0xff] }
  0xbb   :  { %1421 = vmatpush1.bf16.msra.mxu0 %v1420_v35  ;;  %1487 = vmatprep.subr.bf16.mxu1 %v1486_v40  ;;  %v1442_v35 = vpack.c.bf16 %v489_v29, %v483_v28  ;;  %v501_v40 = vld [vmem:[#allocation10 + $0x518] sm:$0xff]  ;;  %v355_v28 = vld [vmem:[#allocation10 + $0x88] sm:$0xff]  ;;  %v801_v46 = vld [vmem:[#allocation11 + $0xa0] sm:$0xff] }
  0xbc   :  { %1423 = vmatprep.subr.bf16.mxu0 %v1422_v39  ;;  %v495_v39 = vld [vmem:[#allocation10 + $0x4e8] sm:$0xff]  ;;  %v1526_v37 = vpack.c.bf16 %v361_v30, %v355_v28  ;;  %v366_v50 = vld [vmem:[#allocation10 + $0xe0] sm:$0xff]  ;;  %v397_v3 = vld [vmem:[#allocation10 + $0x1d8] sm:$0xff] }
  0xbd   :  { %v788_v6 = vld [vmem:[#allocation11 + $0x38] sm:$0xff]  ;;  %v789_v17 = vld [vmem:[#allocation11 + $0x40] sm:$0xff]  ;;  %v790_v18 = vld [vmem:[#allocation11 + $0x48] sm:$0xff] }
  0xbe   :  { %1489 = vmatpush1.bf16.msra.mxu1 %v1488_v48  ;;  %v1510_v48 = vpack.c.bf16 %v503_v42, %v497_v41  ;;  %v373_v42 = vld [vmem:[#allocation10 + $0x118] sm:$0xff]  ;;  %v1600_v14 = vpack.c.bf16 %v788_v6, %v787_v5 }
  0xbf   :  { %1425 = vmatpush1.bf16.msra.mxu0 %v1424_v47  ;;  %1491 = vmatprep.subr.bf16.mxu1 %v1490_v52  ;;  %v1446_v47 = vpack.c.bf16 %v501_v40, %v495_v39  ;;  %v513_v52 = vld [vmem:[#allocation10 + $0x578] sm:$0xff]  ;;  %v360_v39 = vld [vmem:[#allocation10 + $0xb0] sm:$0xff]  ;;  %v367_v40 = vld [vmem:[#allocation10 + $0xe8] sm:$0xff] }
  0xc0   :  { %1427 = vmatprep.subr.bf16.mxu0 %v1426_v51  ;;  %v507_v51 = vld [vmem:[#allocation10 + $0x548] sm:$0xff]  ;;  %v1530_v49 = vpack.c.bf16 %v373_v42, %v367_v40  ;;  %v409_v15 = vld [vmem:[#allocation10 + $0x238] sm:$0xff]  ;;  %v793_v42 = vld [vmem:[#allocation11 + $0x60] sm:$0xff] }
  0xc1   :  { %v1450_v57 = vpack.c.bf16 %v513_v52, %v507_v51  ;;  %v372_v51 = vld [vmem:[#allocation10 + $0x110] sm:$0xff]  ;;  %v379_v52 = vld [vmem:[#allocation10 + $0x148] sm:$0xff]  ;;  %v792_v30 = vld [vmem:[#allocation11 + $0x58] sm:$0xff] }
  0xc2   :  { %1493 = vmatpush1.bf16.msra.mxu1 %v1492_v60  ;;  %v1514_v60 = vpack.c.bf16 %v515_v54, %v509_v53  ;;  %v385_v54 = vld [vmem:[#allocation10 + $0x178] sm:$0xff] }
  0xc3   :  { %1429 = vmatpush1.bf16.msra.mxu0 %v1428_v59  ;;  %1495 = vmatprep.subr.bf16.mxu1 %v1494_v1  ;;  %v512_v59 = vld [vmem:[#allocation10 + $0x570] sm:$0xff]  ;;  %v433_v40 = vld [vmem:[#allocation10 + $0x2f8] sm:$0xff] }
  0xc4   :  { %1431 = vmatprep.subr.bf16.mxu0 %v1430_v63  ;;  %v1452_v61 = vpack.c.bf16 %v512_v59, %v506_v58  ;;  %v514_v63 = vld [vmem:[#allocation10 + $0x580] sm:$0xff]  ;;  %v803_v58 = vld [vmem:[#allocation11 + $0xb0] sm:$0xff]  ;;  %v804_v59 = vld [vmem:[#allocation11 + $0xb8] sm:$0xff] }
  0xc5   :  { %v1516_v1 = vpack.c.bf16 %v514_v63, %v508_v62  ;;  %v378_v62 = vld [vmem:[#allocation10 + $0x140] sm:$0xff]  ;;  %v384_v63 = vld [vmem:[#allocation10 + $0x170] sm:$0xff]  ;;  %v481_v5 = vld [vmem:[#allocation10 + $0x478] sm:$0xff] }
  0xc6   :  { %1497 = vmatpush1.bf16.msra.mxu1 %v1496_v9  ;;  %v527_v9 = vld [vmem:[#allocation10 + $0x5e8] sm:$0xff] }
  0xc7   :  { %1433 = vmatpush1.bf16.msra.mxu0 %v1432_v8  ;;  %1499 = vmatprep.subr.bf16.mxu1 %v1498_v13  ;;  %v521_v8 = vld [vmem:[#allocation10 + $0x5b8] sm:$0xff] }
  0xc8   :  { %1435 = vmatprep.subr.bf16.mxu0 %v1434_v12  ;;  %v1518_v11 = vpack.c.bf16 %v527_v9, %v521_v8  ;;  %v526_v12 = vld [vmem:[#allocation10 + $0x5e0] sm:$0xff]  ;;  %v806_v8 = vld [vmem:[#allocation11 + $0xc8] sm:$0xff]  ;;  %v1536_v9 = vpack.c.bf16 %v384_v63, %v378_v62  ;;  %v469_v62 = vld [vmem:[#allocation10 + $0x418] sm:$0xff] }
  0xc9   :  { %v1520_v13 = vpack.c.bf16 %v526_v12, %v520_v10  ;;  %v396_v12 = vld [vmem:[#allocation10 + $0x1d0] sm:$0xff] }
  0xca   :  { %1501 = vmatpush1.bf16.msra.mxu1 %v1500_v21  ;;  %v1141_v21 = vld [vmem:[%s2139_s5] ss:$0 sm:$0xff] }
  0xcb   :  { %1437 = vmatpush1.bf16.msra.mxu0 %v1436_v20  ;;  %1503 = vmatprep.subr.bf16.mxu1 %v1502_v25 }
  0xcc   :  { %1439 = vmatprep.subr.bf16.mxu0 %v1438_v24 }
  0xce   :  { %1505 = vmatpush1.bf16.msra.mxu1 %v1504_v0 }
  0xcf   :  { %1441 = vmatpush1.bf16.msra.mxu0 %v1440_v32  ;;  %1507 = vmatprep.subr.bf16.mxu1 %v1506_v36  ;;  %v782_v32 = vld [vmem:[#allocation11 + $0x8] sm:$0xff]  ;;  %v1524_v36 = vpack.c.bf16 %v348_v27, %v342_v26  ;;  %v1604_v26 = vpack.c.bf16 %v790_v18, %v789_v17  ;;  %v421_v27 = vld [vmem:[#allocation10 + $0x298] sm:$0xff] }
  0xd0   :  { %1443 = vmatprep.subr.bf16.mxu0 %v1442_v35  ;;  %v1588_v41 = vpack.c.bf16 %v782_v32, %v781_v31  ;;  %v809_v31 = vld [vmem:[#allocation11 + $0xe0] sm:$0xff]  ;;  %v810_v32 = vld [vmem:[#allocation11 + $0xe8] sm:$0xff]  ;;  %v505_v17 = vld [vmem:[#allocation10 + $0x538] sm:$0xff] }
  0xd2   :  { %1509 = vmatpush1.bf16.msra.mxu1 %v1508_v44  ;;  %v783_v44 = vld [vmem:[#allocation11 + $0x10] sm:$0xff] }
  0xd3   :  { %1445 = vmatpush1.bf16.msra.mxu0 %v1444_v43  ;;  %1511 = vmatprep.subr.bf16.mxu1 %v1510_v48  ;;  %v1590_v43 = vpack.c.bf16 %v800_v34, %v799_v33  ;;  %v1528_v48 = vpack.c.bf16 %v360_v39, %v354_v38  ;;  %v1592_v53 = vpack.c.bf16 %v784_v45, %v783_v44  ;;  %v427_v38 = vld [vmem:[#allocation10 + $0x2c8] sm:$0xff] }
  0xd4   :  { %1447 = vmatprep.subr.bf16.mxu0 %v1446_v47  ;;  %v802_v47 = vld [vmem:[#allocation11 + $0xa8] sm:$0xff]  ;;  %v1550_v45 = vpack.c.bf16 %v433_v40, %v427_v38  ;;  %v796_v40 = vld [vmem:[#allocation11 + $0x78] sm:$0xff] }
  0xd6   :  { %1513 = vmatpush1.bf16.msra.mxu1 %v1512_v56  ;;  %v785_v56 = vld [vmem:[#allocation11 + $0x20] sm:$0xff] }
  0xd7   :  { %1449 = vmatpush1.bf16.msra.mxu0 %v1448_v55  ;;  %1515 = vmatprep.subr.bf16.mxu1 %v1514_v60  ;;  %v1594_v55 = vpack.c.bf16 %v802_v47, %v801_v46  ;;  %v1532_v60 = vpack.c.bf16 %v372_v51, %v366_v50  ;;  %v426_v46 = vld [vmem:[#allocation10 + $0x2c0] sm:$0xff]  ;;  %v432_v47 = vld [vmem:[#allocation10 + $0x2f0] sm:$0xff]  ;;  %v445_v50 = vld [vmem:[#allocation10 + $0x358] sm:$0xff] }
  0xd8   :  { %1451 = vmatprep.subr.bf16.mxu0 %v1450_v57  ;;  %v786_v57 = vld [vmem:[#allocation11 + $0x28] sm:$0xff]  ;;  %v1552_v51 = vpack.c.bf16 %v432_v47, %v426_v46 }
  0xd9   :  { %v1596_v2 = vpack.c.bf16 %v786_v57, %v785_v56  ;;  %v457_v56 = vld [vmem:[#allocation10 + $0x3b8] sm:$0xff]  ;;  %v1020_v46 = vld [vmem:[#allocation13 + $0x88] sm:$0xff] }
  0xda   :  { %1517 = vmatpush1.bf16.msra.mxu1 %v1516_v1  ;;  %v391_v1 = vld [vmem:[#allocation10 + $0x1a8] sm:$0xff] }
  0xdb   :  { %1453 = vmatpush1.bf16.msra.mxu0 %v1452_v61  ;;  %1519 = vmatprep.subr.bf16.mxu1 %v1518_v11  ;;  %v1534_v61 = vpack.c.bf16 %v385_v54, %v379_v52  ;;  %v1538_v10 = vpack.c.bf16 %v397_v3, %v391_v1  ;;  %v390_v11 = vld [vmem:[#allocation10 + $0x1a0] sm:$0xff]  ;;  %v444_v54 = vld [vmem:[#allocation10 + $0x350] sm:$0xff] }
  0xdc   :  { %1455 = vmatprep.subr.bf16.mxu0 %v1454_v4  ;;  %v1598_v4 = vpack.c.bf16 %v804_v59, %v803_v58  ;;  %v450_v59 = vld [vmem:[#allocation10 + $0x380] sm:$0xff]  ;;  %v468_v3 = vld [vmem:[#allocation10 + $0x410] sm:$0xff] }
  0xde   :  { %1521 = vmatpush1.bf16.msra.mxu1 %v1520_v13  ;;  %v403_v13 = vld [vmem:[#allocation10 + $0x208] sm:$0xff] }
  0xdf   :  { %1457 = vmatpush1.bf16.msra.mxu0 %v1456_v7  ;;  %1587 = vmatprep.subr.bf16.mxu1 %v1586_v19  ;;  %v805_v7 = vld [vmem:[#allocation11 + $0xc0] sm:$0xff]  ;;  %v807_v19 = vld [vmem:[#allocation11 + $0xd0] sm:$0xff] }
  0xe0   :  { %1523 = vmatprep.subr.bf16.mxu0 %v1522_v16  ;;  %v1602_v16 = vpack.c.bf16 %v806_v8, %v805_v7  ;;  %v474_v8 = vld [vmem:[#allocation10 + $0x440] sm:$0xff] }
 0x174   :  { %v1195_v20 = vpop.f32.mrb[0].mxu1 }
 0x175   :  { %v225_v23 = vpop.f32.mrb[0].mxu0  ;;  %v1196_v24 = vpop.f32.mrb[1].mxu1 }
 0x176   :  { %v1337_v25 = vpop.f32.mrb[1].mxu0  ;;  %v1197_v29 = vadd.f32 %v1196_v24, %v1195_v20  ;;  %v2081_v0 = vadd.f32 %v1140_v22, %v225_v23  ;;  %v808_v20 = vld [vmem:[#allocation11 + $0xd8] sm:$0xff]  ;;  %v1542_v22 = vpack.c.bf16 %v409_v15, %v403_v13  ;;  %v402_v23 = vld [vmem:[#allocation10 + $0x200] sm:$0xff]  ;;  %v408_v24 = vld [vmem:[#allocation10 + $0x230] sm:$0xff] }
 0x177   :  { %v415_v25 = vld [vmem:[#allocation10 + $0x268] sm:$0xff]  ;;  %v1606_v28 = vpack.c.bf16 %v808_v20, %v807_v19  ;;  %v1544_v33 = vpack.c.bf16 %v408_v24, %v402_v23  ;;  %v492_v15 = vld [vmem:[#allocation10 + $0x4d0] sm:$0xff]  ;;  %v498_v20 = vld [vmem:[#allocation10 + $0x500] sm:$0xff] }
 0x178   :  { %v2083_v35 = vadd.f32 %v1197_v29, %v1141_v21  ;;  %v1540_v21 = vpack.c.bf16 %v396_v12, %v390_v11  ;;  %v791_v29 = vld [vmem:[#allocation11 + $0x50] sm:$0xff]  ;;  %v1546_v34 = vpack.c.bf16 %v421_v27, %v415_v25  ;;  %v493_v11 = vld [vmem:[#allocation10 + $0x4d8] sm:$0xff] }
 0x179   :  { %v1608_v39 = vpack.c.bf16 %v792_v30, %v791_v29  ;;  %v517_v23 = vld [vmem:[#allocation10 + $0x598] sm:$0xff]  ;;  %v516_v27 = vld [vmem:[#allocation10 + $0x590] sm:$0xff] }
 0x17a   :  { %626 = vmatprep.mubr.f32.mxu0 %v2083_v35  ;;  %697 = vmatprep.mubr.f32.mxu1 %v2083_v35  ;;  %v529_v29 = vld [vmem:[#allocation10 + $0x5f8] sm:$0xff] }
 0x17b   :  { %627 = vmatmul.mubr.f32.vlgmr.msra.gmra.mrb[2].mxu0 %v2081_v0  ;;  %698 = vmatmul.mubr.f32.vlgmr.msra.gmra.mrb[2].mxu1 %v2081_v0 }
 0x17c   :  { %1525 = vmatpush1.bf16.msra.mxu0 %v1524_v36  ;;  %768 = vmatprep.mubr.f32.mxu0 %v2083_v35  ;;  %v414_v36 = vld [vmem:[#allocation10 + $0x260] sm:$0xff] }
 0x17d   :  { %1527 = vmatprep.subr.bf16.mxu0 %v1526_v37  ;;  %1589 = vmatpush3.bf16.msra.mxu1 %v1588_v41  ;;  %v420_v37 = vld [vmem:[#allocation10 + $0x290] sm:$0xff]  ;;  %v1610_v41 = vpack.c.bf16 %v810_v32, %v809_v31  ;;  %v522_v32 = vld [vmem:[#allocation10 + $0x5c0] sm:$0xff] }
 0x17e   :  { %1591 = vmatprep.subr.bf16.mxu1 %v1590_v43  ;;  %v794_v43 = vld [vmem:[#allocation11 + $0x68] sm:$0xff]  ;;  %v1548_v44 = vpack.c.bf16 %v420_v37, %v414_v36  ;;  %v811_v36 = vld [vmem:[#allocation11 + $0xf0] sm:$0xff]  ;;  %v812_v37 = vld [vmem:[#allocation11 + $0xf8] sm:$0xff] }
 0x17f   :  { %v1614_v38 = vpack.c.bf16 %v812_v37, %v811_v36 }
 0x180   :  { %1529 = vmatpush1.bf16.msra.mxu0 %v1528_v48  ;;  %v1612_v48 = vpack.c.bf16 %v794_v43, %v793_v42  ;;  %v829_v42 = vld [vmem:[#allocation11 + $0x180] sm:$0xff]  ;;  %v830_v43 = vld [vmem:[#allocation11 + $0x188] sm:$0xff] }
 0x181   :  { %1531 = vmatprep.subr.bf16.mxu0 %v1530_v49  ;;  %1593 = vmatpush3.bf16.msra.mxu1 %v1592_v53  ;;  %v439_v49 = vld [vmem:[#allocation10 + $0x328] sm:$0xff]  ;;  %v438_v53 = vld [vmem:[#allocation10 + $0x320] sm:$0xff] }
 0x182   :  { %1595 = vmatprep.subr.bf16.mxu1 %v1594_v55  ;;  %v1554_v52 = vpack.c.bf16 %v445_v50, %v439_v49  ;;  %v451_v55 = vld [vmem:[#allocation10 + $0x388] sm:$0xff]  ;;  %v1556_v57 = vpack.c.bf16 %v444_v54, %v438_v53  ;;  %v1005_v53 = vld [vmem:[#allocation13 + $0x10] sm:$0xff] }
 0x183   :  { %v1558_v58 = vpack.c.bf16 %v457_v56, %v451_v55  ;;  %v1004_v49 = vld [vmem:[#allocation13 + $0x8] sm:$0xff]  ;;  %v1006_v55 = vld [vmem:[#allocation13 + $0x18] sm:$0xff]  ;;  %v1023_v56 = vld [vmem:[#allocation13 + $0xa0] sm:$0xff] }
 0x184   :  { %1533 = vmatpush1.bf16.msra.mxu0 %v1532_v60  ;;  %v456_v60 = vld [vmem:[#allocation10 + $0x3b0] sm:$0xff] }
 0x185   :  { %1535 = vmatprep.subr.bf16.mxu0 %v1534_v61  ;;  %1597 = vmatpush3.bf16.msra.mxu1 %v1596_v2  ;;  %v463_v61 = vld [vmem:[#allocation10 + $0x3e8] sm:$0xff]  ;;  %v1560_v63 = vpack.c.bf16 %v456_v60, %v450_v59  ;;  %v462_v2 = vld [vmem:[#allocation10 + $0x3e0] sm:$0xff] }
 0x186   :  { %1599 = vmatprep.subr.bf16.mxu1 %v1598_v4  ;;  %v1562_v1 = vpack.c.bf16 %v469_v62, %v463_v61  ;;  %v475_v4 = vld [vmem:[#allocation10 + $0x448] sm:$0xff]  ;;  %v1564_v6 = vpack.c.bf16 %v468_v3, %v462_v2  ;;  %v1007_v60 = vld [vmem:[#allocation13 + $0x20] sm:$0xff]  ;;  %v1025_v62 = vld [vmem:[#allocation13 + $0xb0] sm:$0xff] }
 0x187   :  { %v1566_v7 = vpack.c.bf16 %v481_v5, %v475_v4  ;;  %v1008_v61 = vld [vmem:[#allocation13 + $0x28] sm:$0xff]  ;;  %v1009_v3 = vld [vmem:[#allocation13 + $0x30] sm:$0xff]  ;;  %v1010_v4 = vld [vmem:[#allocation13 + $0x38] sm:$0xff] }
 0x188   :  { %1537 = vmatpush1.bf16.msra.mxu0 %v1536_v9  ;;  %v480_v9 = vld [vmem:[#allocation10 + $0x470] sm:$0xff]  ;;  %v1027_v5 = vld [vmem:[#allocation13 + $0xc0] sm:$0xff] }
 0x189   :  { %1539 = vmatprep.subr.bf16.mxu0 %v1538_v10  ;;  %1601 = vmatpush3.bf16.msra.mxu1 %v1600_v14  ;;  %v487_v10 = vld [vmem:[#allocation10 + $0x4a8] sm:$0xff]  ;;  %v1568_v12 = vpack.c.bf16 %v480_v9, %v474_v8  ;;  %v486_v14 = vld [vmem:[#allocation10 + $0x4a0] sm:$0xff] }
 0x18a   :  { %1603 = vmatprep.subr.bf16.mxu1 %v1602_v16  ;;  %v1570_v13 = vpack.c.bf16 %v493_v11, %v487_v10  ;;  %v499_v16 = vld [vmem:[#allocation10 + $0x508] sm:$0xff]  ;;  %v1572_v18 = vpack.c.bf16 %v492_v15, %v486_v14  ;;  %v1011_v9 = vld [vmem:[#allocation13 + $0x40] sm:$0xff]  ;;  %v1029_v11 = vld [vmem:[#allocation13 + $0xd0] sm:$0xff] }
 0x18b   :  { %v1574_v19 = vpack.c.bf16 %v505_v17, %v499_v16  ;;  %v1012_v10 = vld [vmem:[#allocation13 + $0x48] sm:$0xff]  ;;  %v1013_v15 = vld [vmem:[#allocation13 + $0x50] sm:$0xff]  ;;  %v1014_v16 = vld [vmem:[#allocation13 + $0x58] sm:$0xff] }
 0x18c   :  { %1541 = vmatpush1.bf16.msra.mxu0 %v1540_v21  ;;  %v504_v21 = vld [vmem:[#allocation10 + $0x530] sm:$0xff]  ;;  %v1031_v17 = vld [vmem:[#allocation13 + $0xe0] sm:$0xff] }
 0x18d   :  { %1543 = vmatprep.subr.bf16.mxu0 %v1542_v22  ;;  %1605 = vmatpush3.bf16.msra.mxu1 %v1604_v26  ;;  %v511_v22 = vld [vmem:[#allocation10 + $0x568] sm:$0xff]  ;;  %v1576_v24 = vpack.c.bf16 %v504_v21, %v498_v20  ;;  %v510_v26 = vld [vmem:[#allocation10 + $0x560] sm:$0xff] }
 0x18e   :  { %1607 = vmatprep.subr.bf16.mxu1 %v1606_v28  ;;  %v1578_v25 = vpack.c.bf16 %v517_v23, %v511_v22  ;;  %v523_v28 = vld [vmem:[#allocation10 + $0x5c8] sm:$0xff]  ;;  %v1580_v30 = vpack.c.bf16 %v516_v27, %v510_v26  ;;  %v1015_v21 = vld [vmem:[#allocation13 + $0x60] sm:$0xff]  ;;  %v1017_v27 = vld [vmem:[#allocation13 + $0x70] sm:$0xff] }
 0x18f   :  { %v1582_v31 = vpack.c.bf16 %v529_v29, %v523_v28  ;;  %v1016_v22 = vld [vmem:[#allocation13 + $0x68] sm:$0xff]  ;;  %v1018_v28 = vld [vmem:[#allocation13 + $0x78] sm:$0xff] }
 0x190   :  { %1545 = vmatpush1.bf16.msra.mxu0 %v1544_v33  ;;  %v528_v33 = vld [vmem:[#allocation10 + $0x5f0] sm:$0xff]  ;;  %v1676_v23 = vpack.c.bf16 %v1016_v22, %v1015_v21  ;;  %v1680_v29 = vpack.c.bf16 %v1018_v28, %v1017_v27  ;;  %v844_v27 = vld [vmem:[#allocation11 + $0x1f8] sm:$0xff] }
 0x191   :  { %1547 = vmatprep.subr.bf16.mxu0 %v1546_v34  ;;  %1609 = vmatpush3.bf16.msra.mxu1 %v1608_v39  ;;  %v1584_v34 = vpack.c.bf16 %v528_v33, %v522_v32  ;;  %v795_v39 = vld [vmem:[#allocation11 + $0x70] sm:$0xff]  ;;  %v2097_v33 = vld [vmem:[%s2141_s7] sm:$0x3f] }
 0x192   :  { %1611 = vmatprep.subr.bf16.mxu1 %v1610_v41  ;;  %v1616_v41 = vpack.c.bf16 %v796_v40, %v795_v39 }
 0x194   :  { %1549 = vmatpush1.bf16.msra.mxu0 %v1548_v44  ;;  %v1618_v44 = vpack.c.bf16 %v830_v43, %v829_v42 }
 0x195   :  { %1551 = vmatprep.subr.bf16.mxu0 %v1550_v45  ;;  %1613 = vmatpush3.bf16.msra.mxu1 %v1612_v48  ;;  %v1019_v45 = vld [vmem:[#allocation13 + $0x80] sm:$0xff] }
 0x196   :  { %1615 = vmatprep.subr.bf16.mxu1 %v1614_v38  ;;  %v1650_v47 = vpack.c.bf16 %v1020_v46, %v1019_v45  ;;  %v1003_v48 = vld [vmem:[#allocation13] sm:$0xff]  ;;  %v814_v46 = vld [vmem:[#allocation11 + $0x108] sm:$0xff] }
 0x197   :  { %v1652_v50 = vpack.c.bf16 %v1004_v49, %v1003_v48  ;;  %v813_v45 = vld [vmem:[#allocation11 + $0x100] sm:$0xff]  ;;  %v831_v49 = vld [vmem:[#allocation11 + $0x190] sm:$0xff] }
 0x198   :  { %1553 = vmatpush1.bf16.msra.mxu0 %v1552_v51  ;;  %v1021_v51 = vld [vmem:[#allocation13 + $0x90] sm:$0xff] }
 0x199   :  { %1555 = vmatprep.subr.bf16.mxu0 %v1554_v52  ;;  %1617 = vmatpush3.bf16.msra.mxu1 %v1616_v41  ;;  %v1022_v52 = vld [vmem:[#allocation13 + $0x98] sm:$0xff] }
 0x19a   :  { %1619 = vmatprep.subr.bf16.mxu1 %v1618_v44  ;;  %v1654_v54 = vpack.c.bf16 %v1022_v52, %v1021_v51  ;;  %v1620_v52 = vpack.c.bf16 %v814_v46, %v813_v45 }
 0x19c   :  { %1557 = vmatpush1.bf16.msra.mxu0 %v1556_v57  ;;  %v1024_v57 = vld [vmem:[#allocation13 + $0xa8] sm:$0xff] }
 0x19d   :  { %1559 = vmatprep.subr.bf16.mxu0 %v1558_v58  ;;  %v1656_v58 = vpack.c.bf16 %v1006_v55, %v1005_v53  ;;  %v1658_v59 = vpack.c.bf16 %v1024_v57, %v1023_v56  ;;  %v815_v55 = vld [vmem:[#allocation11 + $0x110] sm:$0xff]  ;;  %v816_v56 = vld [vmem:[#allocation11 + $0x118] sm:$0xff] }
 0x1a0   :  { %1561 = vmatpush1.bf16.msra.mxu0 %v1560_v63  ;;  %v1026_v63 = vld [vmem:[#allocation13 + $0xb8] sm:$0xff] }
 0x1a1   :  { %1563 = vmatprep.subr.bf16.mxu0 %v1562_v1  ;;  %v1660_v1 = vpack.c.bf16 %v1008_v61, %v1007_v60  ;;  %v1662_v2 = vpack.c.bf16 %v1026_v63, %v1025_v62  ;;  %v1624_v60 = vpack.c.bf16 %v816_v56, %v815_v55  ;;  %v817_v62 = vld [vmem:[#allocation11 + $0x120] sm:$0xff]  ;;  %v818_v63 = vld [vmem:[#allocation11 + $0x128] sm:$0xff] }
 0x1a4   :  { %1565 = vmatpush1.bf16.msra.mxu0 %v1564_v6  ;;  %v1028_v6 = vld [vmem:[#allocation13 + $0xc8] sm:$0xff] }
 0x1a5   :  { %1567 = vmatprep.subr.bf16.mxu0 %v1566_v7  ;;  %v1664_v7 = vpack.c.bf16 %v1010_v4, %v1009_v3  ;;  %v1666_v8 = vpack.c.bf16 %v1028_v6, %v1027_v5  ;;  %v1628_v3 = vpack.c.bf16 %v818_v63, %v817_v62  ;;  %v819_v5 = vld [vmem:[#allocation11 + $0x130] sm:$0xff]  ;;  %v820_v6 = vld [vmem:[#allocation11 + $0x138] sm:$0xff] }
 0x1a8   :  { %1569 = vmatpush1.bf16.msra.mxu0 %v1568_v12  ;;  %v1030_v12 = vld [vmem:[#allocation13 + $0xd8] sm:$0xff] }
 0x1a9   :  { %1571 = vmatprep.subr.bf16.mxu0 %v1570_v13  ;;  %v1668_v13 = vpack.c.bf16 %v1012_v10, %v1011_v9  ;;  %v1670_v14 = vpack.c.bf16 %v1030_v12, %v1029_v11  ;;  %v1632_v9 = vpack.c.bf16 %v820_v6, %v819_v5  ;;  %v821_v11 = vld [vmem:[#allocation11 + $0x140] sm:$0xff]  ;;  %v822_v12 = vld [vmem:[#allocation11 + $0x148] sm:$0xff] }
 0x1ac   :  { %1573 = vmatpush1.bf16.msra.mxu0 %v1572_v18  ;;  %v1032_v18 = vld [vmem:[#allocation13 + $0xe8] sm:$0xff] }
 0x1ad   :  { %1575 = vmatprep.subr.bf16.mxu0 %v1574_v19  ;;  %v1672_v19 = vpack.c.bf16 %v1014_v16, %v1013_v15  ;;  %v1674_v20 = vpack.c.bf16 %v1032_v18, %v1031_v17  ;;  %v1636_v15 = vpack.c.bf16 %v822_v12, %v821_v11  ;;  %v823_v17 = vld [vmem:[#allocation11 + $0x150] sm:$0xff]  ;;  %v824_v18 = vld [vmem:[#allocation11 + $0x158] sm:$0xff] }
 0x1ae   :  { %v1640_v21 = vpack.c.bf16 %v824_v18, %v823_v17 }
 0x1b0   :  { %1577 = vmatpush1.bf16.msra.mxu0 %v1576_v24  ;;  %v1033_v24 = vld [vmem:[#allocation13 + $0xf0] sm:$0xff] }
 0x1b1   :  { %1579 = vmatprep.subr.bf16.mxu0 %v1578_v25  ;;  %v1034_v25 = vld [vmem:[#allocation13 + $0xf8] sm:$0xff] }
 0x1b2   :  { %v1678_v26 = vpack.c.bf16 %v1034_v25, %v1033_v24  ;;  %v825_v24 = vld [vmem:[#allocation11 + $0x160] sm:$0xff]  ;;  %v826_v25 = vld [vmem:[#allocation11 + $0x168] sm:$0xff] }
 0x1b3   :  { %v1644_v28 = vpack.c.bf16 %v826_v25, %v825_v24 }
 0x1b4   :  { %1581 = vmatpush1.bf16.msra.mxu0 %v1580_v30  ;;  %v532_v30 = vlaneseq }
 0x1b5   :  { %1583 = vmatprep.subr.bf16.mxu0 %v1582_v31 }
 0x1b6   :  { %v2091_v31 = vshrl.u32 %v532_v30, 7 }
 0x1b8   :  { %1585 = vmatpush1.bf16.msra.mxu0 %v1584_v34  ;;  %v534_v32 = vsub.s32 0, %v2091_v31  ;;  %v538_v34 = vsub.s32 1, %v2091_v31  ;;  %v546_v36 = vsub.s32 3, %v2091_v31  ;;  %v542_v22 = vsub.s32 2, %v2091_v31 }
 0x1b9   :  { %1651 = vmatprep.subr.bf16.mxu0 %v1650_v47 }
 0x1ba   :  { %v535_v37 = vrot.slane %v2097_v33, %v534_v32  ;;  %v539_v38 = vrot.slane %v2097_v33, %v538_v34  ;;  %v547_v39 = vrot.slane %v2097_v33, %v546_v36  ;;  %v827_v32 = vld [vmem:[#allocation11 + $0x170] sm:$0xff]  ;;  %v828_v34 = vld [vmem:[#allocation11 + $0x178] sm:$0xff] }
 0x1bb   :  { %769 = vmatmul.mubr.f32.vlgmr.msra.gmra.mrb[4].mxu0 %v2081_v0  ;;  %v1648_v36 = vpack.c.bf16 %v828_v34, %v827_v32 }
 0x1bc   :  { %1653 = vmatpush3.bf16.msra.mxu0 %v1652_v50  ;;  %v832_v50 = vld [vmem:[#allocation11 + $0x198] sm:$0xff] }
 0x1bd   :  { %1655 = vmatprep.subr.bf16.mxu0 %v1654_v54  ;;  %v1622_v54 = vpack.c.bf16 %v832_v50, %v831_v49 }
 0x1c0   :  { %1657 = vmatpush3.bf16.msra.mxu0 %v1656_v58  ;;  %v833_v58 = vld [vmem:[#allocation11 + $0x1a0] sm:$0xff] }
 0x1c1   :  { %1659 = vmatprep.subr.bf16.mxu0 %v1658_v59  ;;  %v834_v59 = vld [vmem:[#allocation11 + $0x1a8] sm:$0xff] }
 0x1c2   :  { %v1626_v61 = vpack.c.bf16 %v834_v59, %v833_v58 }
 0x1c4   :  { %1661 = vmatpush3.bf16.msra.mxu0 %v1660_v1  ;;  %v835_v1 = vld [vmem:[#allocation11 + $0x1b0] sm:$0xff] }
 0x1c5   :  { %1663 = vmatprep.subr.bf16.mxu0 %v1662_v2  ;;  %v836_v2 = vld [vmem:[#allocation11 + $0x1b8] sm:$0xff] }
 0x1c6   :  { %v1630_v4 = vpack.c.bf16 %v836_v2, %v835_v1 }
 0x1c8   :  { %1665 = vmatpush3.bf16.msra.mxu0 %v1664_v7  ;;  %v837_v7 = vld [vmem:[#allocation11 + $0x1c0] sm:$0xff] }
 0x1c9   :  { %1667 = vmatprep.subr.bf16.mxu0 %v1666_v8  ;;  %v838_v8 = vld [vmem:[#allocation11 + $0x1c8] sm:$0xff] }
 0x1ca   :  { %v1634_v10 = vpack.c.bf16 %v838_v8, %v837_v7 }
 0x1cc   :  { %1669 = vmatpush3.bf16.msra.mxu0 %v1668_v13  ;;  %v839_v13 = vld [vmem:[#allocation11 + $0x1d0] sm:$0xff] }
 0x1cd   :  { %1671 = vmatprep.subr.bf16.mxu0 %v1670_v14  ;;  %v840_v14 = vld [vmem:[#allocation11 + $0x1d8] sm:$0xff] }
 0x1ce   :  { %v1638_v16 = vpack.c.bf16 %v840_v14, %v839_v13 }
 0x1d0   :  { %1673 = vmatpush3.bf16.msra.mxu0 %v1672_v19  ;;  %v841_v19 = vld [vmem:[#allocation11 + $0x1e0] sm:$0xff] }
 0x1d1   :  { %1675 = vmatprep.subr.bf16.mxu0 %v1674_v20  ;;  %v842_v20 = vld [vmem:[#allocation11 + $0x1e8] sm:$0xff] }
 0x1d4   :  { %1677 = vmatpush3.bf16.msra.mxu0 %v1676_v23  ;;  %v1642_v23 = vpack.c.bf16 %v842_v20, %v841_v19 }
 0x1d5   :  { %1679 = vmatprep.subr.bf16.mxu0 %v1678_v26  ;;  %v843_v26 = vld [vmem:[#allocation11 + $0x1f0] sm:$0xff] }
 0x1d6   :  { %v1646_v30 = vpack.c.bf16 %v844_v27, %v843_v26 }
 0x1d8   :  { %1681 = vmatpush3.bf16.msra.mxu0 %v1680_v29  ;;  %v543_v29 = vrot.slane %v2097_v33, %v542_v22 }
 0x24e   :  { %v628_v40 = vpop.f32.mrb[2].mxu0  ;;  %v2104_v41 = vpop.f32.mrb[2].mxu1 }
 0x24f   :  { %v629_v42 = vadd.f32 %v628_v40, %v535_v37  ;;  %v630_v43 = vpop.f32.mrb[3].mxu0  ;;  %v701_v44 = vpop.f32.mrb[3].mxu1  ;;  %v700_v37 = vadd.f32 %v2104_v41, %v543_v29  ;;  %v554_v40 = vsub.s32 5, %v2091_v31 }
 0x250   :  { %v631_v47 = vadd.f32 %v630_v43, %v539_v38  ;;  %v702_v48 = vadd.f32 %v701_v44, %v547_v39  ;;  %v550_v39 = vsub.s32 4, %v2091_v31 }
 0x251   :  { %v775_v53 = vmax.f32 %v629_v42, 0.0  ;;  %v777_v38 = vmax.f32 %v700_v37, 0.0  ;;  %v555_v43 = vrot.slane %v2097_v33, %v554_v40 }
 0x252   :  { %v776_v51 = vmax.f32 %v631_v47, 0.0  ;;  %v778_v57 = vmax.f32 %v702_v48, 0.0  ;;  %v551_v42 = vrot.slane %v2097_v33, %v550_v39 }
 0x254   :  { %916 = vmatprep.mubr.f32.mxu1 %v776_v51 }
 0x255   :  { %917 = vmatmul.mubr.f32.vlgmr.msra.gmra.mrb[4].mxu1 %v775_v53 }
 0x256   :  { %1621 = vmatpush3.bf16.msra.mxu1 %v1620_v52  ;;  %986 = vmatprep.mubr.f32.mxu1 %v778_v57  ;;  %v1142_v52 = vld [vmem:[%s2143_s9] ss:$0 sm:$0xff]  ;;  %s1905_s9 = smov [#allocation14]  }
 0x257   :  { %1623 = vmatprep.subr.bf16.mxu1 %v1622_v54 }
 0x25a   :  { %1625 = vmatpush3.bf16.msra.mxu1 %v1624_v60  ;;  %v1144_v60 = vld [vmem:[%s2145_s11] ss:$0 sm:$0xff]  ;;  %s1128_s11 = sshll.u32 %s1905_s9, 4  ;;  %s1129_s11 = int_to_ptr.vmem [resolvable:$true] %s1128_s11 }
 0x25b   :  { %1627 = vmatprep.subr.bf16.mxu1 %v1626_v61  ;;  %s1859_s17 = scalar_lea.vmem %s1129_s11, 128  ;;  %p1864_p1 = scmp.lt.s32.totalorder %s1129_s11, %s1129_s11 }
 0x25c   :  { %p1860_p0 = scmp.ne.s32.totalorder %s1129_s11, %s1859_s17  ;;  %p1865_p2 = scmp.lt.s32.totalorder %s1859_s17, %s1859_s17 }
 0x25e   :  { %1629 = vmatpush3.bf16.msra.mxu1 %v1628_v3  ;;  %p1866_p3 = por %p1865_p2, %p1864_p1 }
 0x25f   :  { %1631 = vmatprep.subr.bf16.mxu1 %v1630_v4 }
 0x260   :  { %p1867_p4 = pnand %p1866_p3, %p1860_p0 }
 0x262   :  { %1633 = vmatpush3.bf16.msra.mxu1 %v1632_v9  ;;  %v1000_v9 = vsub.f32 %v2081_v0, %v2083_v35 }
 0x263   :  { %1635 = vmatprep.subr.bf16.mxu1 %v1634_v10 }
 0x266   :  { %1637 = vmatpush3.bf16.msra.mxu1 %v1636_v15 }
 0x267   :  { %1639 = vmatprep.subr.bf16.mxu1 %v1638_v16 }
 0x26a   :  { %1641 = vmatpush3.bf16.msra.mxu1 %v1640_v21 }
 0x26b   :  { %1643 = vmatprep.subr.bf16.mxu1 %v1642_v23 }
 0x26e   :  { %1645 = vmatpush3.bf16.msra.mxu1 %v1644_v28 }
 0x26f   :  { %1647 = vmatprep.subr.bf16.mxu1 %v1646_v30 }
 0x272   :  { %1649 = vmatpush3.bf16.msra.mxu1 %v1648_v36 }
 0x275   :  { %987 = vmatmul.mubr.f32.vlgmr.msra.gmra.mrb[6].mxu1 %v777_v38 }
 0x28e   :  { %v770_v44 = vpop.f32.mrb[4].mxu0 }
 0x28f   :  { %v771_v45 = vadd.f32 %v770_v44, %v551_v42  ;;  %v772_v46 = vpop.f32.mrb[5].mxu0 }
 0x290   :  { %v773_v47 = vadd.f32 %v772_v46, %v555_v43 }
 0x291   :  { %v779_v49 = vmax.f32 %v771_v45, 0.0 }
 0x292   :  { %v780_v48 = vmax.f32 %v773_v47, 0.0 }
 0x294   :  { %1106 = vmatprep.mubr.f32.mxu0 %v780_v48 }
 0x295   :  { %1107 = vmatmul.mubr.f32.vlgmr.msra.gmra.mrb[6].mxu0 %v779_v49 }
 0x328   :  { %v1230_v41 = vpop.f32.mrb[4].mxu1 }
 0x329   :  { %v1231_v50 = vpop.f32.mrb[5].mxu1 }
 0x32a   :  { %v1232_v51 = vadd.f32 %v1231_v50, %v1230_v41 }
 0x32c   :  { %v919_v54 = vadd.f32 %v1232_v51, %v1142_v52 }
 0x348   :  { %v1265_v31 = vpop.f32.mrb[6].mxu1 }
 0x349   :  { %v1266_v53 = vpop.f32.mrb[7].mxu1 }
 0x34a   :  { %v1267_v55 = vadd.f32 %v1266_v53, %v1265_v31 }
 0x34c   :  { %v989_v33 = vadd.f32 %v1267_v55, %v919_v54 }
 0x34e   :  { %v1143_v56 = vclamps-f32 %v989_v33, 30.0 }
 0x350   :  { %v994_v57 = vsub.f32 0.0, %v1143_v56 }
 0x352   :  { %v995_v58 = vmul.f32 1.442695, %v994_v57 }
 0x354   :  { %1697 = vpow2.f32 %v995_v58 }
 0x35e   :  { %v1698_v3 = vpop.eup %1697 }
 0x35f   :  { %v997_v5 = vadd.f32 1.0, %v1698_v3 }
 0x368   :  { %v1300_v59 = vpop.f32.mrb[6].mxu0 }
 0x369   :  { %v1301_v61 = vpop.f32.mrb[7].mxu0 }
 0x36a   :  { %v1302_v62 = vadd.f32 %v1301_v61, %v1300_v59 }
 0x36c   :  { %v1109_v63 = vadd.f32 %v1302_v62, %v1144_v60 }
 0x36e   :  { %v1145_v1 = vclamps-f32 %v1109_v63, 30.0 }
 0x370   :  { %v1114_v2 = vsub.f32 0.0, %v1145_v1 }
 0x372   :  { %v1115_v4 = vmul.f32 1.442695, %v1114_v2 }
 0x374   :  { %1699 = vpow2.f32 %v1115_v4 }
 0x375   :  { %1701 = vrcp.f32 %v997_v5 }
 0x37e   :  { %v1700_v6 = vpop.eup %1699 }
 0x37f   :  { %v1117_v7 = vadd.f32 1.0, %v1700_v6  ;;  %v1702_v8 = vpop.eup %1701 }
 0x380   :  { %v1001_v10 = vmul.f32 %v1702_v8, %v1000_v9 }
 0x381   :  { %1703 = vrcp.f32 %v1117_v7 }
 0x382   :  { %v1002_v11 = vadd.f32 %v1001_v10, %v2083_v35 }
 0x38b   :  { %v1704_v12 = vpop.eup %1703 }
 0x38c   :  { %v1120_v13 = vmul.f32 %v1704_v12, %v1002_v11 }
 0x38e   :  { %1121 = vst [vmem:[#allocation14] sm:$0xff] %v1120_v13 }
 0x38f   :  { %1870 = shalt.err (!%p1867_p4)
}
 0x390   :  { %s1871_s26 = scalar_lea.hbm %s2146_s12, 128 }
 0x391   :  { %p1872_p5 = scmp.ne.s32.totalorder %s2146_s12, %s1871_s26  ;;  %p1875_p6 = scmp.lt.u32.totalorder %s1871_s26, %s2146_s12 }
 0x393   :  { %p1877_p7 = pnand %p1875_p6, %p1872_p5 }
 0x395   :  { %1880 = shalt.err (!%p1877_p7)
}
 0x396   :  { %1131 = dma.vmem_to_hbm [thread:$0]  %s1129_s11, 128, %s2146_s12, [#allocation4]  }
 0x397   :  { %1889 = dma.done.wait [#allocation4], 128  }
 0x398   :  { %1890 = vsyncadd [#allocation4], 4294967168 }
 0x399   :  { %1135 = vsyncpa [#allocation3], 1 }
 0x39a   :  { %1136 = vsyncpa [#allocation6], 1 }
 0x39b   :  { %1137 = vsyncpa [#allocation9], 1 }
 0x39c   :  { %1138 = vsyncpa [#allocation12], 1 }
 0x39d   :  { %1139 = vsyncpa [#allocation4], 1 }

</bundles_post_ra>
